<compile_context>
chip_gen: v7x
topology: tpu7x:2x2x1
jax: 0.10.0
libtpu: 0.0.40
codegen_flags: <defaults>
</compile_context>

<pallas_src>
import functools
import numpy as np
import jax
import jax.numpy as jnp
from jax.experimental import pallas as pl
from jax.experimental.pallas import tpu as pltpu

_VSPEC = pl.BlockSpec(memory_space=pltpu.MemorySpace.VMEM)


# --------------------------------------------------------------------------- Pallas kernels

def _matmul_bias_relu_kernel(relu, w_ref, x_ref, b_ref, o_ref):
    """o = maybe_relu(w @ x + b); w:(Co,K) bf16, x:(K,M) bf16, b:(Co,1) f32, o:(Co,M)."""
    acc = jnp.dot(w_ref[...], x_ref[...], preferred_element_type=jnp.float32)
    acc = acc + b_ref[...]
    if relu:
        acc = jnp.maximum(acc, 0.0)
    o_ref[...] = acc.astype(o_ref.dtype)


def matmul_bias_relu(w, x, b, *, relu, out_dtype):
    co, k = w.shape
    k2, m = x.shape
    assert k == k2
    return pl.pallas_call(
        functools.partial(_matmul_bias_relu_kernel, relu),
        out_shape=jax.ShapeDtypeStruct((co, m), out_dtype),
        in_specs=[_VSPEC, _VSPEC, _VSPEC],
        out_specs=_VSPEC,
    )(w, x, b)


def _fpn_head_kernel(c10_ref, c7_ref, c4_ref,
                     wo1_ref, wi1_ref, bi1_ref, wo2_ref, up1_ref,
                     wi2_ref, bi2_ref, wo3_ref, up2_ref,
                     out3_ref, out2_ref, out1_ref):
    """Fused FPN head. Activations are (C, N*H*W); upsample = right-matmul with up*_ref."""
    f32 = jnp.float32
    c10 = c10_ref[...]

    # output_feature3 = output1(conv10)              (1x1 conv, no bias)
    out3_ref[...] = jnp.dot(wo1_ref[...], c10, preferred_element_type=f32)

    # intra_feat = bilinear_up2x(conv10) + inner1(conv7)
    up1 = jnp.dot(c10, up1_ref[...], preferred_element_type=f32)
    skip1 = jnp.dot(wi1_ref[...], c7_ref[...], preferred_element_type=f32)
    intra1 = up1 + skip1 + bi1_ref[...]
    intra1_bf = intra1.astype(jnp.bfloat16)
    # output_feature2 = output2(intra_feat)
    out2_ref[...] = jnp.dot(wo2_ref[...], intra1_bf, preferred_element_type=f32)

    # intra_feat = bilinear_up2x(intra_feat) + inner2(conv4)
    up2 = jnp.dot(intra1_bf, up2_ref[...], preferred_element_type=f32)
    skip2 = jnp.dot(wi2_ref[...], c4_ref[...], preferred_element_type=f32)
    intra2 = (up2 + skip2 + bi2_ref[...]).astype(jnp.bfloat16)
    # output_feature1 = output3(intra_feat)
    out1_ref[...] = jnp.dot(wo3_ref[...], intra2, preferred_element_type=f32)


# --------------------------------------------------------------------------- upsample matrices

def _upsample_axis_matrix(size):
    """(2*size, size) bilinear x2 interpolation matrix, align_corners=False (PyTorch)."""
    out = 2 * size
    A = np.zeros((out, size), dtype=np.float32)
    for o in range(out):
        src = max((o + 0.5) / 2.0 - 0.5, 0.0)
        i0 = int(np.floor(src))
        frac = src - i0
        i0c = min(i0, size - 1)
        i1c = min(i0 + 1, size - 1)
        A[o, i0c] += 1.0 - frac
        A[o, i1c] += frac
    return A


def _upsample2x_matrix_flat(n, h, w):
    """(n*h*w, n*2h*2w) matrix U such that up_flat = act_flat @ U for (C, n*h*w) acts."""
    K = np.kron(_upsample_axis_matrix(h), _upsample_axis_matrix(w))  # (4hw, hw)
    U = np.zeros((n * h * w, n * 4 * h * w), dtype=np.float32)
    for i in range(n):
        U[i * h * w:(i + 1) * h * w, i * 4 * h * w:(i + 1) * 4 * h * w] = K.T
    return U  # all entries are exactly representable in bf16


# --------------------------------------------------------------------------- XLA glue (layout)

def _im2col_t(x, k, stride, pad):
    """x: (C, N, H, W) -> patches (k*k*C, N*Ho*Wo); reduction order (kh, kw, c)."""
    c, n, h, w = x.shape
    ho = (h + 2 * pad - k) // stride + 1
    wo = (w + 2 * pad - k) // stride + 1
    xp = jnp.pad(x, ((0, 0), (0, 0), (pad, pad), (pad, pad)))
    taps = []
    for kh in range(k):
        for kw in range(k):
            taps.append(xp[:, :, kh:kh + stride * ho:stride, kw:kw + stride * wo:stride])
    patches = jnp.concatenate(taps, axis=0)                 # (k*k*C, N, Ho, Wo)
    return patches.reshape(k * k * c, n * ho * wo), (n, ho, wo)


def conv_bn_relu(x, p, k, stride, pad):
    """ConvBnReLU with BN folded into p['w'] (bf16) and p['b'] (f32)."""
    patches, (n, ho, wo) = _im2col_t(x, k, stride, pad)
    cout = p["w"].shape[0]
    y = matmul_bias_relu(p["w"], patches, p["b"], relu=True, out_dtype=jnp.bfloat16)
    return y.reshape(cout, n, ho, wo)


# --------------------------------------------------------------------------- parameters

_CBR_SPECS = [
    ("conv0", 3, 8, 3), ("conv1", 8, 8, 3), ("conv2", 8, 16, 5),
    ("conv3", 16, 16, 3), ("conv4", 16, 16, 3), ("conv5", 16, 32, 5),
    ("conv6", 32, 32, 3), ("conv7", 32, 32, 3), ("conv8", 32, 64, 5),
    ("conv9", 64, 64, 3), ("conv10", 64, 64, 3),
]


def _orthogonal(key, rows, cols):
    a = jax.random.normal(key, (max(rows, cols), min(rows, cols)), jnp.float32)
    q, _ = jnp.linalg.qr(a)
    if rows < cols:
        q = q.T
    return q[:rows, :cols]


def init_params(key):
    params = {}
    keys = jax.random.split(key, len(_CBR_SPECS) + 7)
    for i, (name, cin, cout, k) in enumerate(_CBR_SPECS):
        w = jax.random.normal(keys[i], (k, k, cin, cout), jnp.float32) / np.sqrt(k * k * cin)
        params[name] = dict(
            w=w,
            gamma=jnp.ones((cout,), jnp.float32),
            beta=jnp.zeros((cout,), jnp.float32),
            mean=jnp.zeros((cout,), jnp.float32),
            var=jnp.ones((cout,), jnp.float32),
        )
    j = len(_CBR_SPECS)
    # 1x1 convs stored as (Cout, Cin) like nn.Conv2d weights, orthogonal init.
    params["output1_w"] = _orthogonal(keys[j + 0], 64, 64)
    params["inner1_w"] = _orthogonal(keys[j + 1], 64, 32)
    params["inner1_b"] = 0.01 * jax.random.normal(keys[j + 2], (64,), jnp.float32)
    params["inner2_w"] = _orthogonal(keys[j + 3], 64, 16)
    params["inner2_b"] = 0.01 * jax.random.normal(keys[j + 4], (64,), jnp.float32)
    params["output2_w"] = _orthogonal(keys[j + 5], 32, 64)
    params["output3_w"] = _orthogonal(keys[j + 6], 16, 64)
    return params


def prepare_params(params, eps=1e-5):
    """Fold BN into the conv weights, reshape to (Cout, k*k*Cin), cast matmul operands to bf16."""
    prep = {}
    for name, cin, cout, k in _CBR_SPECS:
        p = params[name]
        inv_std = 1.0 / jnp.sqrt(p["var"] + eps)
        scale = p["gamma"] * inv_std                                         # (cout,)
        w_r = jnp.transpose(p["w"], (3, 0, 1, 2)).reshape(cout, k * k * cin)  # (kh,kw,ci) order
        prep[name] = dict(
            w=(w_r * scale[:, None]).astype(jnp.bfloat16),                   # BN scale folded
            b=(p["beta"] - p["mean"] * scale).reshape(cout, 1).astype(jnp.float32),
        )
    for nm in ("output1_w", "inner1_w", "inner2_w", "output2_w", "output3_w"):
        prep[nm] = params[nm].astype(jnp.bfloat16)
    prep["inner1_b"] = params["inner1_b"].reshape(64, 1).astype(jnp.float32)
    prep["inner2_b"] = params["inner2_b"].reshape(64, 1).astype(jnp.float32)
    return prep


# --------------------------------------------------------------------------- forward

def _fpn_head(prep, conv10, conv7, conv4):
    _, n, h3, w3 = conv10.shape
    _, _, h2, w2 = conv7.shape
    _, _, h1, w1 = conv4.shape
    c10 = conv10.reshape(64, n * h3 * w3)
    c7 = conv7.reshape(32, n * h2 * w2)
    c4 = conv4.reshape(16, n * h1 * w1)
    up1 = jnp.asarray(_upsample2x_matrix_flat(n, h3, w3), jnp.bfloat16)   # 1/8 -> 1/4 grid
    up2 = jnp.asarray(_upsample2x_matrix_flat(n, h2, w2), jnp.bfloat16)   # 1/4 -> 1/2 grid

    out_shape = (
        jax.ShapeDtypeStruct((64, n * h3 * w3), jnp.float32),
        jax.ShapeDtypeStruct((32, n * h2 * w2), jnp.float32),
        jax.ShapeDtypeStruct((16, n * h1 * w1), jnp.float32),
    )
    out3, out2, out1 = pl.pallas_call(
        _fpn_head_kernel,
        out_shape=out_shape,
        in_specs=[_VSPEC] * 12,
        out_specs=(_VSPEC, _VSPEC, _VSPEC),
    )(c10, c7, c4,
      prep["output1_w"], prep["inner1_w"], prep["inner1_b"], prep["output2_w"], up1,
      prep["inner2_w"], prep["inner2_b"], prep["output3_w"], up2)

    # back to NCHW like the PyTorch reference
    out3 = jnp.transpose(out3.reshape(64, n, h3, w3), (1, 0, 2, 3))
    out2 = jnp.transpose(out2.reshape(32, n, h2, w2), (1, 0, 2, 3))
    out1 = jnp.transpose(out1.reshape(16, n, h1, w1), (1, 0, 2, 3))
    return out3, out2, out1


@jax.jit
def feature_net_forward(prep, x_nchw):
    x = jnp.transpose(x_nchw, (1, 0, 2, 3)).astype(jnp.bfloat16)   # (C=3, N, H, W)

    a = conv_bn_relu(x, prep["conv0"], 3, 1, 1)
    a = conv_bn_relu(a, prep["conv1"], 3, 1, 1)
    a = conv_bn_relu(a, prep["conv2"], 5, 2, 2)
    a = conv_bn_relu(a, prep["conv3"], 3, 1, 1)
    conv4 = conv_bn_relu(a, prep["conv4"], 3, 1, 1)                # (16, N, H/2, W/2)
    a = conv_bn_relu(conv4, prep["conv5"], 5, 2, 2)
    a = conv_bn_relu(a, prep["conv6"], 3, 1, 1)
    conv7 = conv_bn_relu(a, prep["conv7"], 3, 1, 1)                # (32, N, H/4, W/4)
    a = conv_bn_relu(conv7, prep["conv8"], 5, 2, 2)
    a = conv_bn_relu(a, prep["conv9"], 3, 1, 1)
    conv10 = conv_bn_relu(a, prep["conv10"], 3, 1, 1)              # (64, N, H/8, W/8)

    return _fpn_head(prep, conv10, conv7, conv4)                   # NCHW outputs


# --------------------------------------------------------------------------- main

if __name__ == "__main__":
    params = init_params(jax.random.PRNGKey(42))
    prep = prepare_params(params)
    x = jax.random.normal(jax.random.PRNGKey(0), (2, 3, 16, 16), jnp.float32)  # NCHW

    out3, out2, out1 = feature_net_forward(prep, x)
    out3, out2, out1 = jax.block_until_ready((out3, out2, out1))

    assert out3.shape == (2, 64, 2, 2), out3.shape   # 1/8 resolution, 64 ch
    assert out2.shape == (2, 32, 4, 4), out2.shape   # 1/4 resolution, 32 ch
    assert out1.shape == (2, 16, 8, 8), out1.shape   # 1/2 resolution, 16 ch
    assert all(bool(jnp.isfinite(o).all()) for o in (out3, out2, out1))

    print("KERNEL_OK")
</pallas_src>

<mosaic_0001>
module attributes {stable_mosaic.version = 11 : i64} {
  func.func @_matmul_bias_relu_kernel(%arg0: memref<8x27xbf16, #tpu.memory_space<vmem>>, %arg1: memref<27x512xbf16, #tpu.memory_space<vmem>>, %arg2: memref<8x1xf32, #tpu.memory_space<vmem>>, %arg3: memref<8x512xbf16, #tpu.memory_space<vmem>>) attributes {dimension_semantics = [], scalar_prefetch = 0 : i64, scratch_operands = 0 : i64, tpu.core_type = #tpu.core_type<tc>} {
    %c0 = arith.constant 0 : index
    %c0_0 = arith.constant 0 : index
    %0 = vector.load %arg0[%c0, %c0_0] : memref<8x27xbf16, #tpu.memory_space<vmem>>, vector<8x27xbf16>
    %c0_1 = arith.constant 0 : index
    %c0_2 = arith.constant 0 : index
    %1 = vector.load %arg1[%c0_1, %c0_2] : memref<27x512xbf16, #tpu.memory_space<vmem>>, vector<27x512xbf16>
    %cst = arith.constant dense<0.000000e+00> : vector<8x512xf32>
    %2 = tpu.matmul %0, %1, %cst {dimension_numbers = #tpu.dot_dimension_numbers<[1], [0], [0], [1], [0, 0, 1, 1], [], []>} : vector<8x27xbf16>, vector<27x512xbf16>, vector<8x512xf32> -> vector<8x512xf32>
    %c0_3 = arith.constant 0 : index
    %c0_4 = arith.constant 0 : index
    %3 = vector.load %arg2[%c0_3, %c0_4] : memref<8x1xf32, #tpu.memory_space<vmem>>, vector<8x1xf32>
    %4 = vector.broadcast %3 : vector<8x1xf32> to vector<8x512xf32>
    %5 = arith.addf %2, %4 : vector<8x512xf32>
    %cst_5 = arith.constant 0.000000e+00 : f32
    %6 = vector.broadcast %cst_5 : f32 to vector<8x512xf32>
    %7 = arith.maximumf %5, %6 : vector<8x512xf32>
    %8 = arith.truncf %7 : vector<8x512xf32> to vector<8x512xbf16>
    %c0_6 = arith.constant 0 : index
    %c0_7 = arith.constant 0 : index
    %9 = vector.load %arg3[%c0_6, %c0_7] : memref<8x512xbf16, #tpu.memory_space<vmem>>, vector<8x512xbf16>
    tpu.vector_store %arg3[%c0_6, %c0_7], %8 {strides = array<i32>} : memref<8x512xbf16, #tpu.memory_space<vmem>>, vector<8x512xbf16>,
    return
  }
}

module attributes {stable_mosaic.version = 11 : i64} {
  func.func @_matmul_bias_relu_kernel(%arg0: memref<8x72xbf16, #tpu.memory_space<vmem>>, %arg1: memref<72x512xbf16, #tpu.memory_space<vmem>>, %arg2: memref<8x1xf32, #tpu.memory_space<vmem>>, %arg3: memref<8x512xbf16, #tpu.memory_space<vmem>>) attributes {dimension_semantics = [], scalar_prefetch = 0 : i64, scratch_operands = 0 : i64, tpu.core_type = #tpu.core_type<tc>} {
    %c0 = arith.constant 0 : index
    %c0_0 = arith.constant 0 : index
    %0 = vector.load %arg0[%c0, %c0_0] : memref<8x72xbf16, #tpu.memory_space<vmem>>, vector<8x72xbf16>
    %c0_1 = arith.constant 0 : index
    %c0_2 = arith.constant 0 : index
    %1 = vector.load %arg1[%c0_1, %c0_2] : memref<72x512xbf16, #tpu.memory_space<vmem>>, vector<72x512xbf16>
    %cst = arith.constant dense<0.000000e+00> : vector<8x512xf32>
    %2 = tpu.matmul %0, %1, %cst {dimension_numbers = #tpu.dot_dimension_numbers<[1], [0], [0], [1], [0, 0, 1, 1], [], []>} : vector<8x72xbf16>, vector<72x512xbf16>, vector<8x512xf32> -> vector<8x512xf32>
    %c0_3 = arith.constant 0 : index
    %c0_4 = arith.constant 0 : index
    %3 = vector.load %arg2[%c0_3, %c0_4] : memref<8x1xf32, #tpu.memory_space<vmem>>, vector<8x1xf32>
    %4 = vector.broadcast %3 : vector<8x1xf32> to vector<8x512xf32>
    %5 = arith.addf %2, %4 : vector<8x512xf32>
    %cst_5 = arith.constant 0.000000e+00 : f32
    %6 = vector.broadcast %cst_5 : f32 to vector<8x512xf32>
    %7 = arith.maximumf %5, %6 : vector<8x512xf32>
    %8 = arith.truncf %7 : vector<8x512xf32> to vector<8x512xbf16>
    %c0_6 = arith.constant 0 : index
    %c0_7 = arith.constant 0 : index
    %9 = vector.load %arg3[%c0_6, %c0_7] : memref<8x512xbf16, #tpu.memory_space<vmem>>, vector<8x512xbf16>
    tpu.vector_store %arg3[%c0_6, %c0_7], %8 {strides = array<i32>} : memref<8x512xbf16, #tpu.memory_space<vmem>>, vector<8x512xbf16>,
    return
  }
}

module attributes {stable_mosaic.version = 11 : i64} {
  func.func @_matmul_bias_relu_kernel(%arg0: memref<16x200xbf16, #tpu.memory_space<vmem>>, %arg1: memref<200x128xbf16, #tpu.memory_space<vmem>>, %arg2: memref<16x1xf32, #tpu.memory_space<vmem>>, %arg3: memref<16x128xbf16, #tpu.memory_space<vmem>>) attributes {dimension_semantics = [], scalar_prefetch = 0 : i64, scratch_operands = 0 : i64, tpu.core_type = #tpu.core_type<tc>} {
    %c0 = arith.constant 0 : index
    %c0_0 = arith.constant 0 : index
    %0 = vector.load %arg0[%c0, %c0_0] : memref<16x200xbf16, #tpu.memory_space<vmem>>, vector<16x200xbf16>
    %c0_1 = arith.constant 0 : index
    %c0_2 = arith.constant 0 : index
    %1 = vector.load %arg1[%c0_1, %c0_2] : memref<200x128xbf16, #tpu.memory_space<vmem>>, vector<200x128xbf16>
    %cst = arith.constant dense<0.000000e+00> : vector<16x128xf32>
    %2 = tpu.matmul %0, %1, %cst {dimension_numbers = #tpu.dot_dimension_numbers<[1], [0], [0], [1], [0, 0, 1, 1], [], []>} : vector<16x200xbf16>, vector<200x128xbf16>, vector<16x128xf32> -> vector<16x128xf32>
    %c0_3 = arith.constant 0 : index
    %c0_4 = arith.constant 0 : index
    %3 = vector.load %arg2[%c0_3, %c0_4] : memref<16x1xf32, #tpu.memory_space<vmem>>, vector<16x1xf32>
    %4 = vector.broadcast %3 : vector<16x1xf32> to vector<16x128xf32>
    %5 = arith.addf %2, %4 : vector<16x128xf32>
    %cst_5 = arith.constant 0.000000e+00 : f32
    %6 = vector.broadcast %cst_5 : f32 to vector<16x128xf32>
    %7 = arith.maximumf %5, %6 : vector<16x128xf32>
    %8 = arith.truncf %7 : vector<16x128xf32> to vector<16x128xbf16>
    %c0_6 = arith.constant 0 : index
    %c0_7 = arith.constant 0 : index
    %9 = vector.load %arg3[%c0_6, %c0_7] : memref<16x128xbf16, #tpu.memory_space<vmem>>, vector<16x128xbf16>
    tpu.vector_store %arg3[%c0_6, %c0_7], %8 {strides = array<i32>} : memref<16x128xbf16, #tpu.memory_space<vmem>>, vector<16x128xbf16>,
    return
  }
}

module attributes {stable_mosaic.version = 11 : i64} {
  func.func @_matmul_bias_relu_kernel(%arg0: memref<16x144xbf16, #tpu.memory_space<vmem>>, %arg1: memref<144x128xbf16, #tpu.memory_space<vmem>>, %arg2: memref<16x1xf32, #tpu.memory_space<vmem>>, %arg3: memref<16x128xbf16, #tpu.memory_space<vmem>>) attributes {dimension_semantics = [], scalar_prefetch = 0 : i64, scratch_operands = 0 : i64, tpu.core_type = #tpu.core_type<tc>} {
    %c0 = arith.constant 0 : index
    %c0_0 = arith.constant 0 : index
    %0 = vector.load %arg0[%c0, %c0_0] : memref<16x144xbf16, #tpu.memory_space<vmem>>, vector<16x144xbf16>
    %c0_1 = arith.constant 0 : index
    %c0_2 = arith.constant 0 : index
    %1 = vector.load %arg1[%c0_1, %c0_2] : memref<144x128xbf16, #tpu.memory_space<vmem>>, vector<144x128xbf16>
    %cst = arith.constant dense<0.000000e+00> : vector<16x128xf32>
    %2 = tpu.matmul %0, %1, %cst {dimension_numbers = #tpu.dot_dimension_numbers<[1], [0], [0], [1], [0, 0, 1, 1], [], []>} : vector<16x144xbf16>, vector<144x128xbf16>, vector<16x128xf32> -> vector<16x128xf32>
    %c0_3 = arith.constant 0 : index
    %c0_4 = arith.constant 0 : index
    %3 = vector.load %arg2[%c0_3, %c0_4] : memref<16x1xf32, #tpu.memory_space<vmem>>, vector<16x1xf32>
    %4 = vector.broadcast %3 : vector<16x1xf32> to vector<16x128xf32>
    %5 = arith.addf %2, %4 : vector<16x128xf32>
    %cst_5 = arith.constant 0.000000e+00 : f32
    %6 = vector.broadcast %cst_5 : f32 to vector<16x128xf32>
    %7 = arith.maximumf %5, %6 : vector<16x128xf32>
    %8 = arith.truncf %7 : vector<16x128xf32> to vector<16x128xbf16>
    %c0_6 = arith.constant 0 : index
    %c0_7 = arith.constant 0 : index
    %9 = vector.load %arg3[%c0_6, %c0_7] : memref<16x128xbf16, #tpu.memory_space<vmem>>, vector<16x128xbf16>
    tpu.vector_store %arg3[%c0_6, %c0_7], %8 {strides = array<i32>} : memref<16x128xbf16, #tpu.memory_space<vmem>>, vector<16x128xbf16>,
    return
  }
}

module attributes {stable_mosaic.version = 11 : i64} {
  func.func @_matmul_bias_relu_kernel(%arg0: memref<32x400xbf16, #tpu.memory_space<vmem>>, %arg1: memref<400x32xbf16, #tpu.memory_space<vmem>>, %arg2: memref<32x1xf32, #tpu.memory_space<vmem>>, %arg3: memref<32x32xbf16, #tpu.memory_space<vmem>>) attributes {dimension_semantics = [], scalar_prefetch = 0 : i64, scratch_operands = 0 : i64, tpu.core_type = #tpu.core_type<tc>} {
    %c0 = arith.constant 0 : index
    %c0_0 = arith.constant 0 : index
    %0 = vector.load %arg0[%c0, %c0_0] : memref<32x400xbf16, #tpu.memory_space<vmem>>, vector<32x400xbf16>
    %c0_1 = arith.constant 0 : index
    %c0_2 = arith.constant 0 : index
    %1 = vector.load %arg1[%c0_1, %c0_2] : memref<400x32xbf16, #tpu.memory_space<vmem>>, vector<400x32xbf16>
    %cst = arith.constant dense<0.000000e+00> : vector<32x32xf32>
    %2 = tpu.matmul %0, %1, %cst {dimension_numbers = #tpu.dot_dimension_numbers<[1], [0], [0], [1], [0, 0, 1, 1], [], []>} : vector<32x400xbf16>, vector<400x32xbf16>, vector<32x32xf32> -> vector<32x32xf32>
    %c0_3 = arith.constant 0 : index
    %c0_4 = arith.constant 0 : index
    %3 = vector.load %arg2[%c0_3, %c0_4] : memref<32x1xf32, #tpu.memory_space<vmem>>, vector<32x1xf32>
    %4 = vector.broadcast %3 : vector<32x1xf32> to vector<32x32xf32>
    %5 = arith.addf %2, %4 : vector<32x32xf32>
    %cst_5 = arith.constant 0.000000e+00 : f32
    %6 = vector.broadcast %cst_5 : f32 to vector<32x32xf32>
    %7 = arith.maximumf %5, %6 : vector<32x32xf32>
    %8 = arith.truncf %7 : vector<32x32xf32> to vector<32x32xbf16>
    %c0_6 = arith.constant 0 : index
    %c0_7 = arith.constant 0 : index
    %9 = vector.load %arg3[%c0_6, %c0_7] : memref<32x32xbf16, #tpu.memory_space<vmem>>, vector<32x32xbf16>
    tpu.vector_store %arg3[%c0_6, %c0_7], %8 {strides = array<i32>} : memref<32x32xbf16, #tpu.memory_space<vmem>>, vector<32x32xbf16>,
    return
  }
}

module attributes {stable_mosaic.version = 11 : i64} {
  func.func @_matmul_bias_relu_kernel(%arg0: memref<32x288xbf16, #tpu.memory_space<vmem>>, %arg1: memref<288x32xbf16, #tpu.memory_space<vmem>>, %arg2: memref<32x1xf32, #tpu.memory_space<vmem>>, %arg3: memref<32x32xbf16, #tpu.memory_space<vmem>>) attributes {dimension_semantics = [], scalar_prefetch = 0 : i64, scratch_operands = 0 : i64, tpu.core_type = #tpu.core_type<tc>} {
    %c0 = arith.constant 0 : index
    %c0_0 = arith.constant 0 : index
    %0 = vector.load %arg0[%c0, %c0_0] : memref<32x288xbf16, #tpu.memory_space<vmem>>, vector<32x288xbf16>
    %c0_1 = arith.constant 0 : index
    %c0_2 = arith.constant 0 : index
    %1 = vector.load %arg1[%c0_1, %c0_2] : memref<288x32xbf16, #tpu.memory_space<vmem>>, vector<288x32xbf16>
    %cst = arith.constant dense<0.000000e+00> : vector<32x32xf32>
    %2 = tpu.matmul %0, %1, %cst {dimension_numbers = #tpu.dot_dimension_numbers<[1], [0], [0], [1], [0, 0, 1, 1], [], []>} : vector<32x288xbf16>, vector<288x32xbf16>, vector<32x32xf32> -> vector<32x32xf32>
    %c0_3 = arith.constant 0 : index
    %c0_4 = arith.constant 0 : index
    %3 = vector.load %arg2[%c0_3, %c0_4] : memref<32x1xf32, #tpu.memory_space<vmem>>, vector<32x1xf32>
    %4 = vector.broadcast %3 : vector<32x1xf32> to vector<32x32xf32>
    %5 = arith.addf %2, %4 : vector<32x32xf32>
    %cst_5 = arith.constant 0.000000e+00 : f32
    %6 = vector.broadcast %cst_5 : f32 to vector<32x32xf32>
    %7 = arith.maximumf %5, %6 : vector<32x32xf32>
    %8 = arith.truncf %7 : vector<32x32xf32> to vector<32x32xbf16>
    %c0_6 = arith.constant 0 : index
    %c0_7 = arith.constant 0 : index
    %9 = vector.load %arg3[%c0_6, %c0_7] : memref<32x32xbf16, #tpu.memory_space<vmem>>, vector<32x32xbf16>
    tpu.vector_store %arg3[%c0_6, %c0_7], %8 {strides = array<i32>} : memref<32x32xbf16, #tpu.memory_space<vmem>>, vector<32x32xbf16>,
    return
  }
}

module attributes {stable_mosaic.version = 11 : i64} {
  func.func @_matmul_bias_relu_kernel(%arg0: memref<64x800xbf16, #tpu.memory_space<vmem>>, %arg1: memref<800x8xbf16, #tpu.memory_space<vmem>>, %arg2: memref<64x1xf32, #tpu.memory_space<vmem>>, %arg3: memref<64x8xbf16, #tpu.memory_space<vmem>>) attributes {dimension_semantics = [], scalar_prefetch = 0 : i64, scratch_operands = 0 : i64, tpu.core_type = #tpu.core_type<tc>} {
    %c0 = arith.constant 0 : index
    %c0_0 = arith.constant 0 : index
    %0 = vector.load %arg0[%c0, %c0_0] : memref<64x800xbf16, #tpu.memory_space<vmem>>, vector<64x800xbf16>
    %c0_1 = arith.constant 0 : index
    %c0_2 = arith.constant 0 : index
    %1 = vector.load %arg1[%c0_1, %c0_2] : memref<800x8xbf16, #tpu.memory_space<vmem>>, vector<800x8xbf16>
    %cst = arith.constant dense<0.000000e+00> : vector<64x8xf32>
    %2 = tpu.matmul %0, %1, %cst {dimension_numbers = #tpu.dot_dimension_numbers<[1], [0], [0], [1], [0, 0, 1, 1], [], []>} : vector<64x800xbf16>, vector<800x8xbf16>, vector<64x8xf32> -> vector<64x8xf32>
    %c0_3 = arith.constant 0 : index
    %c0_4 = arith.constant 0 : index
    %3 = vector.load %arg2[%c0_3, %c0_4] : memref<64x1xf32, #tpu.memory_space<vmem>>, vector<64x1xf32>
    %4 = vector.broadcast %3 : vector<64x1xf32> to vector<64x8xf32>
    %5 = arith.addf %2, %4 : vector<64x8xf32>
    %cst_5 = arith.constant 0.000000e+00 : f32
    %6 = vector.broadcast %cst_5 : f32 to vector<64x8xf32>
    %7 = arith.maximumf %5, %6 : vector<64x8xf32>
    %8 = arith.truncf %7 : vector<64x8xf32> to vector<64x8xbf16>
    %c0_6 = arith.constant 0 : index
    %c0_7 = arith.constant 0 : index
    %9 = vector.load %arg3[%c0_6, %c0_7] : memref<64x8xbf16, #tpu.memory_space<vmem>>, vector<64x8xbf16>
    tpu.vector_store %arg3[%c0_6, %c0_7], %8 {strides = array<i32>} : memref<64x8xbf16, #tpu.memory_space<vmem>>, vector<64x8xbf16>,
    return
  }
}

module attributes {stable_mosaic.version = 11 : i64} {
  func.func @_matmul_bias_relu_kernel(%arg0: memref<64x576xbf16, #tpu.memory_space<vmem>>, %arg1: memref<576x8xbf16, #tpu.memory_space<vmem>>, %arg2: memref<64x1xf32, #tpu.memory_space<vmem>>, %arg3: memref<64x8xbf16, #tpu.memory_space<vmem>>) attributes {dimension_semantics = [], scalar_prefetch = 0 : i64, scratch_operands = 0 : i64, tpu.core_type = #tpu.core_type<tc>} {
    %c0 = arith.constant 0 : index
    %c0_0 = arith.constant 0 : index
    %0 = vector.load %arg0[%c0, %c0_0] : memref<64x576xbf16, #tpu.memory_space<vmem>>, vector<64x576xbf16>
    %c0_1 = arith.constant 0 : index
    %c0_2 = arith.constant 0 : index
    %1 = vector.load %arg1[%c0_1, %c0_2] : memref<576x8xbf16, #tpu.memory_space<vmem>>, vector<576x8xbf16>
    %cst = arith.constant dense<0.000000e+00> : vector<64x8xf32>
    %2 = tpu.matmul %0, %1, %cst {dimension_numbers = #tpu.dot_dimension_numbers<[1], [0], [0], [1], [0, 0, 1, 1], [], []>} : vector<64x576xbf16>, vector<576x8xbf16>, vector<64x8xf32> -> vector<64x8xf32>
    %c0_3 = arith.constant 0 : index
    %c0_4 = arith.constant 0 : index
    %3 = vector.load %arg2[%c0_3, %c0_4] : memref<64x1xf32, #tpu.memory_space<vmem>>, vector<64x1xf32>
    %4 = vector.broadcast %3 : vector<64x1xf32> to vector<64x8xf32>
    %5 = arith.addf %2, %4 : vector<64x8xf32>
    %cst_5 = arith.constant 0.000000e+00 : f32
    %6 = vector.broadcast %cst_5 : f32 to vector<64x8xf32>
    %7 = arith.maximumf %5, %6 : vector<64x8xf32>
    %8 = arith.truncf %7 : vector<64x8xf32> to vector<64x8xbf16>
    %c0_6 = arith.constant 0 : index
    %c0_7 = arith.constant 0 : index
    %9 = vector.load %arg3[%c0_6, %c0_7] : memref<64x8xbf16, #tpu.memory_space<vmem>>, vector<64x8xbf16>
    tpu.vector_store %arg3[%c0_6, %c0_7], %8 {strides = array<i32>} : memref<64x8xbf16, #tpu.memory_space<vmem>>, vector<64x8xbf16>,
    return
  }
}

module attributes {stable_mosaic.version = 11 : i64} {
  func.func @_fpn_head_kernel(%arg0: memref<64x8xbf16, #tpu.memory_space<vmem>>, %arg1: memref<32x32xbf16, #tpu.memory_space<vmem>>, %arg2: memref<16x128xbf16, #tpu.memory_space<vmem>>, %arg3: memref<64x64xbf16, #tpu.memory_space<vmem>>, %arg4: memref<64x32xbf16, #tpu.memory_space<vmem>>, %arg5: memref<64x1xf32, #tpu.memory_space<vmem>>, %arg6: memref<32x64xbf16, #tpu.memory_space<vmem>>, %arg7: memref<8x32xbf16, #tpu.memory_space<vmem>>, %arg8: memref<64x16xbf16, #tpu.memory_space<vmem>>, %arg9: memref<64x1xf32, #tpu.memory_space<vmem>>, %arg10: memref<16x64xbf16, #tpu.memory_space<vmem>>, %arg11: memref<32x128xbf16, #tpu.memory_space<vmem>>, %arg12: memref<64x8xf32, #tpu.memory_space<vmem>>, %arg13: memref<32x32xf32, #tpu.memory_space<vmem>>, %arg14: memref<16x128xf32, #tpu.memory_space<vmem>>) attributes {dimension_semantics = [], scalar_prefetch = 0 : i64, scratch_operands = 0 : i64, tpu.core_type = #tpu.core_type<tc>} {
    %c0 = arith.constant 0 : index
    %c0_0 = arith.constant 0 : index
    %0 = vector.load %arg0[%c0, %c0_0] : memref<64x8xbf16, #tpu.memory_space<vmem>>, vector<64x8xbf16>
    %c0_1 = arith.constant 0 : index
    %c0_2 = arith.constant 0 : index
    %1 = vector.load %arg3[%c0_1, %c0_2] : memref<64x64xbf16, #tpu.memory_space<vmem>>, vector<64x64xbf16>
    %cst = arith.constant dense<0.000000e+00> : vector<64x8xf32>
    %2 = tpu.matmul %1, %0, %cst {dimension_numbers = #tpu.dot_dimension_numbers<[1], [0], [0], [1], [0, 0, 1, 1], [], []>} : vector<64x64xbf16>, vector<64x8xbf16>, vector<64x8xf32> -> vector<64x8xf32>
    %c0_3 = arith.constant 0 : index
    %c0_4 = arith.constant 0 : index
    %3 = vector.load %arg12[%c0_3, %c0_4] : memref<64x8xf32, #tpu.memory_space<vmem>>, vector<64x8xf32>
    tpu.vector_store %arg12[%c0_3, %c0_4], %2 {strides = array<i32>} : memref<64x8xf32, #tpu.memory_space<vmem>>, vector<64x8xf32>,
    %c0_5 = arith.constant 0 : index
    %c0_6 = arith.constant 0 : index
    %4 = vector.load %arg7[%c0_5, %c0_6] : memref<8x32xbf16, #tpu.memory_space<vmem>>, vector<8x32xbf16>
    %cst_7 = arith.constant dense<0.000000e+00> : vector<64x32xf32>
    %5 = tpu.matmul %0, %4, %cst_7 {dimension_numbers = #tpu.dot_dimension_numbers<[1], [0], [0], [1], [0, 0, 1, 1], [], []>} : vector<64x8xbf16>, vector<8x32xbf16>, vector<64x32xf32> -> vector<64x32xf32>
    %c0_8 = arith.constant 0 : index
    %c0_9 = arith.constant 0 : index
    %6 = vector.load %arg4[%c0_8, %c0_9] : memref<64x32xbf16, #tpu.memory_space<vmem>>, vector<64x32xbf16>
    %c0_10 = arith.constant 0 : index
    %c0_11 = arith.constant 0 : index
    %7 = vector.load %arg1[%c0_10, %c0_11] : memref<32x32xbf16, #tpu.memory_space<vmem>>, vector<32x32xbf16>
    %cst_12 = arith.constant dense<0.000000e+00> : vector<64x32xf32>
    %8 = tpu.matmul %6, %7, %cst_12 {dimension_numbers = #tpu.dot_dimension_numbers<[1], [0], [0], [1], [0, 0, 1, 1], [], []>} : vector<64x32xbf16>, vector<32x32xbf16>, vector<64x32xf32> -> vector<64x32xf32>
    %9 = arith.addf %5, %8 : vector<64x32xf32>
    %c0_13 = arith.constant 0 : index
    %c0_14 = arith.constant 0 : index
    %10 = vector.load %arg5[%c0_13, %c0_14] : memref<64x1xf32, #tpu.memory_space<vmem>>, vector<64x1xf32>
    %11 = vector.broadcast %10 : vector<64x1xf32> to vector<64x32xf32>
    %12 = arith.addf %9, %11 : vector<64x32xf32>
    %13 = arith.truncf %12 : vector<64x32xf32> to vector<64x32xbf16>
    %c0_15 = arith.constant 0 : index
    %c0_16 = arith.constant 0 : index
    %14 = vector.load %arg6[%c0_15, %c0_16] : memref<32x64xbf16, #tpu.memory_space<vmem>>, vector<32x64xbf16>
    %cst_17 = arith.constant dense<0.000000e+00> : vector<32x32xf32>
    %15 = tpu.matmul %14, %13, %cst_17 {dimension_numbers = #tpu.dot_dimension_numbers<[1], [0], [0], [1], [0, 0, 1, 1], [], []>} : vector<32x64xbf16>, vector<64x32xbf16>, vector<32x32xf32> -> vector<32x32xf32>
    %c0_18 = arith.constant 0 : index
    %c0_19 = arith.constant 0 : index
    %16 = vector.load %arg13[%c0_18, %c0_19] : memref<32x32xf32, #tpu.memory_space<vmem>>, vector<32x32xf32>
    tpu.vector_store %arg13[%c0_18, %c0_19], %15 {strides = array<i32>} : memref<32x32xf32, #tpu.memory_space<vmem>>, vector<32x32xf32>,
    %c0_20 = arith.constant 0 : index
    %c0_21 = arith.constant 0 : index
    %17 = vector.load %arg11[%c0_20, %c0_21] : memref<32x128xbf16, #tpu.memory_space<vmem>>, vector<32x128xbf16>
    %cst_22 = arith.constant dense<0.000000e+00> : vector<64x128xf32>
    %18 = tpu.matmul %13, %17, %cst_22 {dimension_numbers = #tpu.dot_dimension_numbers<[1], [0], [0], [1], [0, 0, 1, 1], [], []>} : vector<64x32xbf16>, vector<32x128xbf16>, vector<64x128xf32> -> vector<64x128xf32>
    %c0_23 = arith.constant 0 : index
    %c0_24 = arith.constant 0 : index
    %19 = vector.load %arg8[%c0_23, %c0_24] : memref<64x16xbf16, #tpu.memory_space<vmem>>, vector<64x16xbf16>
    %c0_25 = arith.constant 0 : index
    %c0_26 = arith.constant 0 : index
    %20 = vector.load %arg2[%c0_25, %c0_26] : memref<16x128xbf16, #tpu.memory_space<vmem>>, vector<16x128xbf16>
    %cst_27 = arith.constant dense<0.000000e+00> : vector<64x128xf32>
    %21 = tpu.matmul %19, %20, %cst_27 {dimension_numbers = #tpu.dot_dimension_numbers<[1], [0], [0], [1], [0, 0, 1, 1], [], []>} : vector<64x16xbf16>, vector<16x128xbf16>, vector<64x128xf32> -> vector<64x128xf32>
    %22 = arith.addf %18, %21 : vector<64x128xf32>
    %c0_28 = arith.constant 0 : index
    %c0_29 = arith.constant 0 : index
    %23 = vector.load %arg9[%c0_28, %c0_29] : memref<64x1xf32, #tpu.memory_space<vmem>>, vector<64x1xf32>
    %24 = vector.broadcast %23 : vector<64x1xf32> to vector<64x128xf32>
    %25 = arith.addf %22, %24 : vector<64x128xf32>
    %26 = arith.truncf %25 : vector<64x128xf32> to vector<64x128xbf16>
    %c0_30 = arith.constant 0 : index
    %c0_31 = arith.constant 0 : index
    %27 = vector.load %arg10[%c0_30, %c0_31] : memref<16x64xbf16, #tpu.memory_space<vmem>>, vector<16x64xbf16>
    %cst_32 = arith.constant dense<0.000000e+00> : vector<16x128xf32>
    %28 = tpu.matmul %27, %26, %cst_32 {dimension_numbers = #tpu.dot_dimension_numbers<[1], [0], [0], [1], [0, 0, 1, 1], [], []>} : vector<16x64xbf16>, vector<64x128xbf16>, vector<16x128xf32> -> vector<16x128xf32>
    %c0_33 = arith.constant 0 : index
    %c0_34 = arith.constant 0 : index
    %29 = vector.load %arg14[%c0_33, %c0_34] : memref<16x128xf32, #tpu.memory_space<vmem>>, vector<16x128xf32>
    tpu.vector_store %arg14[%c0_33, %c0_34], %28 {strides = array<i32>} : memref<16x128xf32, #tpu.memory_space<vmem>>, vector<16x128xf32>,
    return
  }
}

</mosaic_0001>

<bundles_post_ra>
// kernel: feature_net_forward.12
= control target key start
LH: loop header
LB: loop body
LE: loop exit
PB: predicated region body
PF: predicated region fallthrough
CT: control target
= control target key end

     0   :  { %vm70_vm0 = vcmask 1044480   ;;  %vm71_vm1 = vcmask 1045504   ;;  %v223_v1 = vmov 65535   ;;  %v224_v3 = vmov 0   ;;  %s281_s1 = inlined_call_operand.vmem [shape: bf16[27,512], index: 1, kind: input, shape index: {}]   ;;  %s282_s2 = inlined_call_operand.vmem [shape: f32[8,1], index: 2, kind: input, shape index: {}]   ;;  %s283_s0 = inlined_call_operand.vmem [shape: bf16[8,27], index: 0, kind: input, shape index: {}]   ;;  %s284_s3 = inlined_call_operand.vmem [shape: bf16[8,512], index: 3, kind: output, shape index: {}]  }
   0x1   :  { %v211_v0 = vld [vmem:[%s281_s1 + $0x4] ss:$16 sps:$4 sm:$0xff]   ;;  %v72_v2 = vsel %vm70_vm0, 4294967295, %v223_v1  ;;  %118 = vmatprep.mubr.bf16.mxu0 %v224_v3  ;;  %159 = vmatprep.mubr.bf16.mxu1 %v224_v3  ;;  %v213_v4 = vld [vmem:[%s281_s1 + $0xc] ss:$16 sps:$4 sm:$0xff]   ;;  %vm66_vm2 = vcmask 220160  }
   0x2   :  { %210 = vset.pattern.permute.xlu0 %v224_v3  ;;  %86 = vmatprep.subr.bf16.mxu0 %v211_v0  ;;  %v215_v5 = vld [vmem:[%s281_s1] ss:$16 sps:$4 sm:$0xff]   ;;  %v216_v6 = vld [vmem:[%s281_s1 + $0x8] ss:$16 sps:$4 sm:$0xff]   ;;  %v73_v7 = vsel %vm71_vm1, %v72_v2, 0 }
   0x3   :  { %127 = vmatprep.subr.bf16.mxu1 %v213_v4  ;;  %v217_v8 = vld [vmem:[%s281_s1 + $0x24] ss:$16 sps:$4 sm:$0x3f]   ;;  %87 = vmatpush1.bf16.msra.mxu0 %v215_v5  ;;  %v219_v9 = vld [vmem:[%s281_s1 + $0x2c] ss:$16 sps:$4 sm:$0x3f]  }
   0x4   :  { %128 = vmatpush1.bf16.msra.mxu1 %v216_v6  ;;  %v24_v10 = vld [vmem:[%s282_s2] sm:$0xff]  ;;  %v78_v11 = vand.u32 %v217_v8, %v73_v7  ;;  %v222_v13 = vld [vmem:[%s281_s1 + $0x28] ss:$16 sps:$4 sm:$0x3f]   ;;  %v84_v14 = vand.u32 %v219_v9, %v73_v7 }
   0x5   :  { %v221_v12 = vld [vmem:[%s281_s1 + $0x20] ss:$16 sps:$4 sm:$0x3f]   ;;  %27 = vperm.xlu0 %210, %v24_v10   ;;  %v81_v16 = vand.u32 %v222_v13, %v73_v7 }
   0x6   :  { %88 = vmatprep.subr.bf16.mxu0 %v78_v11  ;;  %v75_v15 = vand.u32 %v221_v12, %v73_v7  ;;  %129 = vmatprep.subr.bf16.mxu1 %v84_v14  ;;  %v15_v17 = vld [vmem:[%s283_s0] sm:$0xf] }
   0x8   :  { %89 = vmatpush1.bf16.msra.mxu0 %v75_v15  ;;  %130 = vmatpush1.bf16.msra.mxu1 %v81_v16 }
   0xb   :  { %202 = vmatmul.mubr.msk.bf16.vlgmr.msra.gmra.mrb[0].mxu0 %vm66_vm2, %v15_v17  ;;  %203 = vmatmul.mubr.msk.bf16.vlgmr.msra.gmra.mrb[0].mxu1 %vm66_vm2, %v15_v17 }
  0x84   :  { %v28_v18 = vpop.permute.xlu0 %27 }
  0xde   :  { %v120_v19 = vpop.f32.mrb[0].mxu0  ;;  %v161_v20 = vpop.f32.mrb[0].mxu1 }
  0xdf   :  { %v121_v21 = vadd.f32 %v120_v19, %v28_v18  ;;  %v162_v22 = vadd.f32 %v161_v20, %v28_v18  ;;  %v122_v23 = vpop.f32.mrb[1].mxu0  ;;  %v163_v24 = vpop.f32.mrb[1].mxu1 }
  0xe0   :  { %v123_v25 = vadd.f32 %v122_v23, %v28_v18  ;;  %v164_v26 = vadd.f32 %v163_v24, %v28_v18  ;;  %v124_v27 = vpop.f32.mrb[2].mxu0  ;;  %v165_v28 = vpop.f32.mrb[2].mxu1 }
  0xe1   :  { %v168_v29 = vmax.f32 %v121_v21, 0.0  ;;  %v170_v30 = vmax.f32 %v162_v22, 0.0  ;;  %v125_v31 = vpop.f32.mrb[3].mxu0  ;;  %v166_v32 = vpop.f32.mrb[3].mxu1 }
  0xe2   :  { %v169_v33 = vmax.f32 %v123_v25, 0.0  ;;  %v171_v34 = vmax.f32 %v164_v26, 0.0 }
  0xe4   :  { %v206_v35 = vpack.c.bf16 %v169_v33, %v168_v29  ;;  %v207_v36 = vpack.c.bf16 %v171_v34, %v170_v30 }
  0xe6   :  { %188 = vst [vmem:[%s284_s3] sm:$0xff] %v206_v35  ;;  %189 = vst [vmem:[%s284_s3 + $0x8] sm:$0xff] %v207_v36 }

// kernel: feature_net_forward.13
= control target key start
LH: loop header
LB: loop body
LE: loop exit
PB: predicated region body
PF: predicated region fallthrough
CT: control target
= control target key end

     0   :  { %v313_v1 = vmov 0   ;;  %vm134_vm0 = vcmask 1043456   ;;  %vm130_vm1 = vcmask 588800   ;;  %s400_s1 = inlined_call_operand.vmem [shape: bf16[72,512], index: 1, kind: input, shape index: {}]   ;;  %s401_s2 = inlined_call_operand.vmem [shape: f32[8,1], index: 2, kind: input, shape index: {}]   ;;  %s402_s0 = inlined_call_operand.vmem [shape: bf16[8,72], index: 0, kind: input, shape index: {}]   ;;  %s403_s3 = inlined_call_operand.vmem [shape: bf16[8,512], index: 3, kind: output, shape index: {}]  }
   0x1   :  { %v285_v0 = vld [vmem:[%s400_s1 + $0x4] ss:$16 sps:$4 sm:$0xff]   ;;  %179 = vmatprep.mubr.bf16.mxu0 %v313_v1  ;;  %220 = vmatprep.mubr.bf16.mxu1 %v313_v1  ;;  %v287_v2 = vld [vmem:[%s400_s1 + $0xc] ss:$16 sps:$4 sm:$0xff]   ;;  %v289_v3 = vld [vmem:[%s400_s1] ss:$16 sps:$4 sm:$0xff]  }
   0x2   :  { %284 = vset.pattern.permute.xlu0 %v313_v1  ;;  %147 = vmatprep.subr.bf16.mxu0 %v285_v0  ;;  %v290_v4 = vld [vmem:[%s400_s1 + $0x8] ss:$16 sps:$4 sm:$0xff]   ;;  %v291_v5 = vld [vmem:[%s400_s1 + $0x24] ss:$16 sps:$4 sm:$0xff]   ;;  %v293_v6 = vld [vmem:[%s400_s1 + $0x2c] ss:$16 sps:$4 sm:$0xff]  }
   0x3   :  { %188 = vmatprep.subr.bf16.mxu1 %v287_v2  ;;  %148 = vmatpush1.bf16.msra.mxu0 %v289_v3  ;;  %v295_v7 = vld [vmem:[%s400_s1 + $0x20] ss:$16 sps:$4 sm:$0xff]   ;;  %v296_v8 = vld [vmem:[%s400_s1 + $0x28] ss:$16 sps:$4 sm:$0xff]   ;;  %v297_v9 = vld [vmem:[%s400_s1 + $0x44] ss:$16 sps:$4 sm:$0xff]  }
   0x4   :  { %189 = vmatpush1.bf16.msra.mxu1 %v290_v4  ;;  %149 = vmatprep.subr.bf16.mxu0 %v291_v5  ;;  %v299_v10 = vld [vmem:[%s400_s1 + $0x4c] ss:$16 sps:$4 sm:$0xff]   ;;  %v301_v11 = vld [vmem:[%s400_s1 + $0x40] ss:$16 sps:$4 sm:$0xff]   ;;  %v302_v12 = vld [vmem:[%s400_s1 + $0x48] ss:$16 sps:$4 sm:$0xff]  }
   0x5   :  { %190 = vmatprep.subr.bf16.mxu1 %v293_v6  ;;  %v303_v13 = vld [vmem:[%s400_s1 + $0x64] ss:$16 sps:$4 sm:$0xff]   ;;  %v305_v14 = vld [vmem:[%s400_s1 + $0x6c] ss:$16 sps:$4 sm:$0xff]   ;;  %v307_v18 = vld [vmem:[%s400_s1 + $0x60] ss:$16 sps:$4 sm:$0xff]  }
   0x6   :  { %v32_v15 = vld [vmem:[%s400_s1 + $0x80] sm:$0xff]  ;;  %v33_v16 = vld [vmem:[%s400_s1 + $0x88] sm:$0xff] }
   0x7   :  { %150 = vmatpush1.bf16.msra.mxu0 %v295_v7  ;;  %v34_v17 = vld [vmem:[%s401_s2] sm:$0xff]  ;;  %v308_v19 = vld [vmem:[%s400_s1 + $0x68] ss:$16 sps:$4 sm:$0xff]   ;;  %v272_v20 = vcombine.high %v32_v15, %v32_v15  ;;  %v274_v21 = vcombine.high %v33_v16, %v33_v16  ;;  %v271_v22 = vcombine.low %v32_v15, %v32_v15  ;;  %v273_v23 = vcombine.low %v33_v16, %v33_v16 }
   0x8   :  { %191 = vmatpush1.bf16.msra.mxu1 %v296_v8  ;;  %151 = vmatprep.subr.bf16.mxu0 %v297_v9  ;;  %v15_v26 = vld [vmem:[%s402_s0] sm:$0xf] }
   0x9   :  { %192 = vmatprep.subr.bf16.mxu1 %v299_v10  ;;  %37 = vperm.xlu0 %284, %v34_v17   ;;  %v136_v24 = vsel %vm134_vm0, %v271_v22, 0  ;;  %v142_v25 = vsel %vm134_vm0, %v273_v23, 0 }
   0xb   :  { %152 = vmatpush1.bf16.msra.mxu0 %v301_v11 }
   0xc   :  { %193 = vmatpush1.bf16.msra.mxu1 %v302_v12  ;;  %153 = vmatprep.subr.bf16.mxu0 %v303_v13 }
   0xd   :  { %194 = vmatprep.subr.bf16.mxu1 %v305_v14 }
   0xf   :  { %154 = vmatpush1.bf16.msra.mxu0 %v307_v18 }
  0x10   :  { %195 = vmatpush1.bf16.msra.mxu1 %v308_v19  ;;  %275 = vmatprep.subr.msk.bf16.mxu0 %vm134_vm0, %v272_v20 }
  0x11   :  { %277 = vmatprep.subr.msk.bf16.mxu1 %vm134_vm0, %v274_v21 }
  0x13   :  { %156 = vmatpush1.bf16.msra.mxu0 %v136_v24 }
  0x14   :  { %197 = vmatpush1.bf16.msra.mxu1 %v142_v25 }
  0x16   :  { %276 = vmatmul.mubr.msk.bf16.vlgmr.msra.gmra.mrb[0].mxu0 %vm130_vm1, %v15_v26 }
  0x17   :  { %278 = vmatmul.mubr.msk.bf16.vlgmr.msra.gmra.mrb[0].mxu1 %vm130_vm1, %v15_v26 }
  0x88   :  { %v38_v27 = vpop.permute.xlu0 %37 }
  0xe9   :  { %v181_v28 = vpop.f32.mrb[0].mxu0 }
  0xea   :  { %v222_v29 = vpop.f32.mrb[0].mxu1  ;;  %v182_v30 = vadd.f32 %v181_v28, %v38_v27  ;;  %v183_v32 = vpop.f32.mrb[1].mxu0 }
  0xeb   :  { %v223_v31 = vadd.f32 %v222_v29, %v38_v27  ;;  %v224_v33 = vpop.f32.mrb[1].mxu1  ;;  %v184_v34 = vadd.f32 %v183_v32, %v38_v27  ;;  %v185_v36 = vpop.f32.mrb[2].mxu0 }
  0xec   :  { %v225_v35 = vadd.f32 %v224_v33, %v38_v27  ;;  %v226_v37 = vpop.f32.mrb[2].mxu1  ;;  %v229_v38 = vmax.f32 %v182_v30, 0.0  ;;  %v186_v40 = vpop.f32.mrb[3].mxu0 }
  0xed   :  { %v231_v39 = vmax.f32 %v223_v31, 0.0  ;;  %v227_v41 = vpop.f32.mrb[3].mxu1  ;;  %v230_v42 = vmax.f32 %v184_v34, 0.0 }
  0xee   :  { %v232_v43 = vmax.f32 %v225_v35, 0.0 }
  0xef   :  { %v281_v44 = vpack.c.bf16 %v230_v42, %v229_v38 }
  0xf0   :  { %v282_v45 = vpack.c.bf16 %v232_v43, %v231_v39 }
  0xf1   :  { %249 = vst [vmem:[%s403_s3] sm:$0xff] %v281_v44 }
  0xf2   :  { %250 = vst [vmem:[%s403_s3 + $0x8] sm:$0xff] %v282_v45 }

// kernel: feature_net_forward.14
= control target key start
LH: loop header
LB: loop body
LE: loop exit
PB: predicated region body
PF: predicated region fallthrough
CT: control target
= control target key end

     0   :  { %v246_v0 = vmov 0   ;;  %vm138_vm0 = vcmask 588800   ;;  %vm142_vm1 = vcmask 1043456   ;;  %s321_s1 = inlined_call_operand.vmem [shape: bf16[200,128], index: 1, kind: input, shape index: {}]   ;;  %s322_s0 = inlined_call_operand.vmem [shape: bf16[16,200], index: 0, kind: input, shape index: {}]   ;;  %s323_s2 = inlined_call_operand.vmem [shape: f32[16,1], index: 2, kind: input, shape index: {}]   ;;  %s324_s3 = inlined_call_operand.vmem [shape: bf16[16,128], index: 3, kind: output, shape index: {}]  }
   0x1   :  { %146 = vmatprep.subr.bf16.mxu0 %v246_v0  ;;  %v230_v1 = vld [vmem:[%s321_s1] sm:$0xff]   ;;  %229 = vset.pattern.permute.xlu0 %v246_v0  ;;  %v231_v2 = vld [vmem:[%s321_s1 + $0x8] sm:$0xff]   ;;  %v232_v3 = vld [vmem:[%s321_s1 + $0x10] sm:$0xff]  }
   0x2   :  { %147 = vmatpush1.bf16.msra.mxu0 %v230_v1  ;;  %v233_v4 = vld [vmem:[%s321_s1 + $0x18] sm:$0xff]   ;;  %v245_v5 = vld [vmem:[%s322_s0 + $0x4] ss:$8 sps:$4 sm:$0xff]   ;;  %v236_v10 = vld [vmem:[%s321_s1 + $0x30] sm:$0xff]  }
   0x3   :  { %148 = vmatprep.subr.bf16.mxu0 %v246_v0  ;;  %v234_v6 = vld [vmem:[%s321_s1 + $0x20] sm:$0xff]   ;;  %218 = vmatprep.mubr.msk.bf16.mxu0 %vm138_vm0, %v245_v5  ;;  %v43_v8 = vld [vmem:[%s323_s2 + $0x8] sm:$0xff]  ;;  %v237_v11 = vld [vmem:[%s321_s1 + $0x38] sm:$0xff]  }
   0x4   :  { %v42_v7 = vld [vmem:[%s323_s2] sm:$0xff]  ;;  %v235_v9 = vld [vmem:[%s321_s1 + $0x28] sm:$0xff]   ;;  %v240_v14 = vld [vmem:[%s321_s1 + $0x50] sm:$0xff]  }
   0x5   :  { %46 = vperm.xlu0 %229, %v42_v7   ;;  %v238_v12 = vld [vmem:[%s321_s1 + $0x40] sm:$0xff]   ;;  %v239_v13 = vld [vmem:[%s321_s1 + $0x48] sm:$0xff]   ;;  %v241_v15 = vld [vmem:[%s321_s1 + $0x58] sm:$0xff]  }
   0x6   :  { %149 = vmatpush1.bf16.msra.mxu0 %v231_v2  ;;  %v242_v16 = vld [vmem:[%s321_s1 + $0x60] ss:$0 sps:$4 sm:$0xff]  }
   0x7   :  { %150 = vmatprep.subr.bf16.mxu0 %v246_v0  ;;  %v144_v17 = vsel %vm142_vm1, %v242_v16, 0  ;;  %v243_v18 = vld [vmem:[%s322_s0] ss:$8 sps:$4 sm:$0xff]  }
   0x9   :  { %51 = vperm.xlu0 %229, %v43_v8  }
   0xa   :  { %151 = vmatpush1.bf16.msra.mxu0 %v232_v3 }
   0xb   :  { %152 = vmatprep.subr.bf16.mxu0 %v246_v0 }
   0xe   :  { %153 = vmatpush1.bf16.msra.mxu0 %v233_v4 }
   0xf   :  { %154 = vmatprep.subr.bf16.mxu0 %v246_v0 }
  0x12   :  { %155 = vmatpush1.bf16.msra.mxu0 %v234_v6 }
  0x13   :  { %156 = vmatprep.subr.bf16.mxu0 %v246_v0 }
  0x16   :  { %157 = vmatpush1.bf16.msra.mxu0 %v235_v9 }
  0x17   :  { %158 = vmatprep.subr.bf16.mxu0 %v246_v0 }
  0x1a   :  { %159 = vmatpush1.bf16.msra.mxu0 %v236_v10 }
  0x1b   :  { %160 = vmatprep.subr.bf16.mxu0 %v246_v0 }
  0x1e   :  { %161 = vmatpush1.bf16.msra.mxu0 %v237_v11 }
  0x1f   :  { %162 = vmatprep.subr.bf16.mxu0 %v246_v0 }
  0x22   :  { %163 = vmatpush1.bf16.msra.mxu0 %v238_v12 }
  0x23   :  { %164 = vmatprep.subr.bf16.mxu0 %v246_v0 }
  0x26   :  { %165 = vmatpush1.bf16.msra.mxu0 %v239_v13 }
  0x27   :  { %166 = vmatprep.subr.bf16.mxu0 %v246_v0 }
  0x2a   :  { %167 = vmatpush1.bf16.msra.mxu0 %v240_v14 }
  0x2b   :  { %168 = vmatprep.subr.bf16.mxu0 %v246_v0 }
  0x2e   :  { %169 = vmatpush1.bf16.msra.mxu0 %v241_v15 }
  0x2f   :  { %170 = vmatprep.subr.bf16.mxu0 %v246_v0 }
  0x32   :  { %171 = vmatpush1.bf16.msra.mxu0 %v144_v17 }
  0x35   :  { %179 = vmatmul.mubr.bf16.vlgmr.msra.gmra.mrb[0].mxu0 %v243_v18 }
  0x84   :  { %v47_v19 = vpop.permute.xlu0 %46 }
  0x88   :  { %v52_v23 = vpop.permute.xlu0 %51 }
 0x108   :  { %v180_v20 = vpop.f32.mrb[0].mxu0 }
 0x109   :  { %v181_v21 = vadd.f32 %v180_v20, %v47_v19  ;;  %v182_v22 = vpop.f32.mrb[1].mxu0 }
 0x10a   :  { %v183_v24 = vpop.f32.mrb[2].mxu0 }
 0x10b   :  { %v184_v25 = vadd.f32 %v183_v24, %v52_v23  ;;  %v185_v26 = vpop.f32.mrb[3].mxu0  ;;  %v187_v27 = vmax.f32 %v181_v21, 0.0 }
 0x10d   :  { %v188_v28 = vmax.f32 %v184_v25, 0.0 }
 0x10f   :  { %v226_v29 = vpack.c.bf16 %v188_v28, %v187_v27 }
 0x111   :  { %227 = vst [vmem:[%s324_s3] sm:$0xff] %v226_v29  }

// kernel: feature_net_forward.15
= control target key start
LH: loop header
LB: loop body
LE: loop exit
PB: predicated region body
PF: predicated region fallthrough
CT: control target
= control target key end

     0   :  { %v206_v0 = vmov 0   ;;  %vm110_vm0 = vcmask 130048   ;;  %s269_s1 = inlined_call_operand.vmem [shape: bf16[144,128], index: 1, kind: input, shape index: {}]   ;;  %s270_s0 = inlined_call_operand.vmem [shape: bf16[16,144], index: 0, kind: input, shape index: {}]   ;;  %s271_s2 = inlined_call_operand.vmem [shape: f32[16,1], index: 2, kind: input, shape index: {}]   ;;  %s272_s3 = inlined_call_operand.vmem [shape: bf16[16,128], index: 3, kind: output, shape index: {}]  }
   0x1   :  { %114 = vmatprep.subr.bf16.mxu0 %v206_v0  ;;  %v194_v1 = vld [vmem:[%s269_s1] sm:$0xff]   ;;  %193 = vset.pattern.permute.xlu0 %v206_v0  ;;  %v195_v2 = vld [vmem:[%s269_s1 + $0x8] sm:$0xff]   ;;  %v196_v3 = vld [vmem:[%s269_s1 + $0x10] sm:$0xff]  }
   0x2   :  { %115 = vmatpush1.bf16.msra.mxu0 %v194_v1  ;;  %v197_v4 = vld [vmem:[%s269_s1 + $0x18] sm:$0xff]   ;;  %v205_v5 = vld [vmem:[%s270_s0 + $0x4] ss:$8 sps:$4 sm:$0xff]   ;;  %v200_v10 = vld [vmem:[%s269_s1 + $0x30] sm:$0xff]  }
   0x3   :  { %116 = vmatprep.subr.bf16.mxu0 %v206_v0  ;;  %v35_v6 = vld [vmem:[%s271_s2] sm:$0xff]  ;;  %182 = vmatprep.mubr.msk.bf16.mxu0 %vm110_vm0, %v205_v5  ;;  %v36_v7 = vld [vmem:[%s271_s2 + $0x8] sm:$0xff]  ;;  %v201_v11 = vld [vmem:[%s269_s1 + $0x38] sm:$0xff]  }
   0x4   :  { %39 = vperm.xlu0 %193, %v35_v6   ;;  %v198_v8 = vld [vmem:[%s269_s1 + $0x20] sm:$0xff]   ;;  %v199_v9 = vld [vmem:[%s269_s1 + $0x28] sm:$0xff]  }
   0x5   :  { %v202_v12 = vld [vmem:[%s269_s1 + $0x40] sm:$0xff]  }
   0x6   :  { %117 = vmatpush1.bf16.msra.mxu0 %v195_v2  ;;  %v203_v13 = vld [vmem:[%s270_s0] ss:$8 sps:$4 sm:$0xff]  }
   0x7   :  { %118 = vmatprep.subr.bf16.mxu0 %v206_v0 }
   0x8   :  { %44 = vperm.xlu0 %193, %v36_v7  }
   0xa   :  { %119 = vmatpush1.bf16.msra.mxu0 %v196_v3 }
   0xb   :  { %120 = vmatprep.subr.bf16.mxu0 %v206_v0 }
   0xe   :  { %121 = vmatpush1.bf16.msra.mxu0 %v197_v4 }
   0xf   :  { %122 = vmatprep.subr.bf16.mxu0 %v206_v0 }
  0x12   :  { %123 = vmatpush1.bf16.msra.mxu0 %v198_v8 }
  0x13   :  { %124 = vmatprep.subr.bf16.mxu0 %v206_v0 }
  0x16   :  { %125 = vmatpush1.bf16.msra.mxu0 %v199_v9 }
  0x17   :  { %126 = vmatprep.subr.bf16.mxu0 %v206_v0 }
  0x1a   :  { %127 = vmatpush1.bf16.msra.mxu0 %v200_v10 }
  0x1b   :  { %128 = vmatprep.subr.bf16.mxu0 %v206_v0 }
  0x1e   :  { %129 = vmatpush1.bf16.msra.mxu0 %v201_v11 }
  0x1f   :  { %130 = vmatprep.subr.bf16.mxu0 %v206_v0 }
  0x22   :  { %131 = vmatpush1.bf16.msra.mxu0 %v202_v12 }
  0x25   :  { %147 = vmatmul.mubr.bf16.vlgmr.msra.gmra.mrb[0].mxu0 %v203_v13 }
  0x83   :  { %v40_v14 = vpop.permute.xlu0 %39 }
  0x87   :  { %v45_v18 = vpop.permute.xlu0 %44 }
  0xf8   :  { %v148_v15 = vpop.f32.mrb[0].mxu0 }
  0xf9   :  { %v149_v16 = vadd.f32 %v148_v15, %v40_v14  ;;  %v150_v17 = vpop.f32.mrb[1].mxu0 }
  0xfa   :  { %v151_v19 = vpop.f32.mrb[2].mxu0 }
  0xfb   :  { %v152_v20 = vadd.f32 %v151_v19, %v45_v18  ;;  %v153_v21 = vpop.f32.mrb[3].mxu0  ;;  %v155_v22 = vmax.f32 %v149_v16, 0.0 }
  0xfd   :  { %v156_v23 = vmax.f32 %v152_v20, 0.0 }
  0xff   :  { %v190_v24 = vpack.c.bf16 %v156_v23, %v155_v22 }
 0x101   :  { %191 = vst [vmem:[%s272_s3] sm:$0xff] %v190_v24  }

// kernel: feature_net_forward.17
= control target key start
LH: loop header
LB: loop body
LE: loop exit
PB: predicated region body
PF: predicated region fallthrough
CT: control target
= control target key end

     0   :  { %v530_v0 = vmov 0   ;;  %vm285_vm0 = vcmask 130048   ;;  %vm410_vm1 = vcmask 257024   ;;  %s691_s1 = inlined_call_operand.vmem [shape: bf16[400,32], index: 1, kind: input, shape index: {}]   ;;  %s692_s0 = inlined_call_operand.vmem [shape: bf16[32,400], index: 0, kind: input, shape index: {}]   ;;  %s693_s2 = inlined_call_operand.vmem [shape: f32[32,1], index: 2, kind: input, shape index: {}]   ;;  %s694_s3 = inlined_call_operand.vmem [shape: bf16[32,32], index: 3, kind: output, shape index: {}]  }
   0x1   :  { %341 = vmatprep.subr.bf16.mxu1 %v530_v0  ;;  %v493_v1 = vld [vmem:[%s691_s1 + $0x40] sm:$0xff]   ;;  %491 = vset.pattern.permute.xlu0 %v530_v0  ;;  %v496_v4 = vld [vmem:[%s691_s1 + $0x48] sm:$0xff]   ;;  %v499_v7 = vld [vmem:[%s691_s1 + $0x50] sm:$0xff]  }
   0x2   :  { %v494_v2 = vld [vmem:[%s691_s1 + $0x80] sm:$0xff]   ;;  %492 = vset.pattern.permute.xlu1 %v530_v0  ;;  %462 = vmatprep.subr.bf16.mxu0 %v493_v1  ;;  %v497_v5 = vld [vmem:[%s691_s1 + $0x88] sm:$0xff]   ;;  %v500_v8 = vld [vmem:[%s691_s1 + $0x90] sm:$0xff]  }
   0x3   :  { %v495_v3 = vld [vmem:[%s691_s1] sm:$0xff]   ;;  %342 = vmatpush1.bf16.msra.mxu1 %v494_v2  ;;  %v498_v6 = vld [vmem:[%s691_s1 + $0x8] sm:$0xff]   ;;  %v501_v9 = vld [vmem:[%s691_s1 + $0x10] sm:$0xff]  }
   0x4   :  { %463 = vmatpush3.bf16.msra.mxu0 %v495_v3  ;;  %343 = vmatprep.subr.bf16.mxu1 %v530_v0  ;;  %v502_v10 = vld [vmem:[%s691_s1 + $0x58] sm:$0xff]   ;;  %v505_v13 = vld [vmem:[%s691_s1 + $0x60] sm:$0xff]   ;;  %v508_v16 = vld [vmem:[%s691_s1 + $0x68] sm:$0xff]  }
   0x5   :  { %464 = vmatprep.subr.bf16.mxu0 %v496_v4  ;;  %v503_v11 = vld [vmem:[%s691_s1 + $0x98] sm:$0xff]   ;;  %v506_v14 = vld [vmem:[%s691_s1 + $0xa0] sm:$0xff]   ;;  %v509_v17 = vld [vmem:[%s691_s1 + $0xa8] sm:$0xff]  }
   0x6   :  { %v504_v12 = vld [vmem:[%s691_s1 + $0x18] sm:$0xff]   ;;  %v507_v15 = vld [vmem:[%s691_s1 + $0x20] sm:$0xff]   ;;  %v510_v18 = vld [vmem:[%s691_s1 + $0x28] sm:$0xff]  }
   0x7   :  { %344 = vmatpush1.bf16.msra.mxu1 %v497_v5  ;;  %v511_v19 = vld [vmem:[%s691_s1 + $0x70] sm:$0xff]   ;;  %v514_v22 = vld [vmem:[%s691_s1 + $0x78] sm:$0xff]   ;;  %v73_v27 = vld [vmem:[%s693_s2] sm:$0xff] }
   0x8   :  { %465 = vmatpush3.bf16.msra.mxu0 %v498_v6  ;;  %345 = vmatprep.subr.bf16.mxu1 %v530_v0  ;;  %v512_v20 = vld [vmem:[%s691_s1 + $0xb0] sm:$0xff]   ;;  %v515_v24 = vld [vmem:[%s691_s1 + $0xb8] sm:$0xff]   ;;  %v520_v30 = vld [vmem:[%s691_s1 + $0xc0] sm:$0xff]  }
   0x9   :  { %466 = vmatprep.subr.bf16.mxu0 %v499_v7  ;;  %v513_v21 = vld [vmem:[%s691_s1 + $0x30] sm:$0xff]   ;;  %v523_v25 = vld [vmem:[%s692_s0 + $0xc] ss:$16 sps:$4 sm:$0xff]   ;;  %79 = vperm.xlu0 %491, %v73_v27   ;;  %v521_v33 = vld [vmem:[%s692_s0 + $0x8] ss:$16 sps:$4 sm:$0xff]  }
   0xa   :  { %v519_v23 = vld [vmem:[%s692_s0 + $0x4] ss:$16 sps:$4 sm:$0xff]   ;;  %v516_v26 = vld [vmem:[%s691_s1 + $0x38] sm:$0xff]   ;;  %452 = vmatprep.mubr.msk.bf16.mxu1 %vm285_vm0, %v523_v25  ;;  %v517_v29 = vld [vmem:[%s692_s0] ss:$16 sps:$4 sm:$0xff]  }
   0xb   :  { %346 = vmatpush1.bf16.msra.mxu1 %v500_v8  ;;  %324 = vmatprep.mubr.bf16.mxu0 %v519_v23  ;;  %v75_v28 = vld [vmem:[%s693_s2 + $0x10] sm:$0xff]  ;;  %v74_v32 = vld [vmem:[%s693_s2 + $0x8] sm:$0xff]  ;;  %v76_v34 = vld [vmem:[%s693_s2 + $0x18] sm:$0xff] }
   0xc   :  { %467 = vmatpush3.bf16.msra.mxu0 %v501_v9  ;;  %347 = vmatprep.subr.bf16.mxu1 %v530_v0  ;;  %v524_v31 = vld [vmem:[%s692_s0 + $0x24] ss:$16 sps:$4 sm:$0xff]   ;;  %v527_v35 = vld [vmem:[%s692_s0 + $0x2c] ss:$16 sps:$4 sm:$0xff]   ;;  %v526_v36 = vld [vmem:[%s692_s0 + $0x20] ss:$16 sps:$4 sm:$0xff]  }
   0xd   :  { %468 = vmatprep.subr.bf16.mxu0 %v502_v10  ;;  %89 = vperm.xlu1 %492, %v75_v28   ;;  %v529_v37 = vld [vmem:[%s692_s0 + $0x28] ss:$16 sps:$4 sm:$0xff]  }
   0xe   :  { %84 = vperm.xlu0 %491, %v74_v32  }
   0xf   :  { %348 = vmatpush1.bf16.msra.mxu1 %v503_v11 }
  0x10   :  { %469 = vmatpush3.bf16.msra.mxu0 %v504_v12  ;;  %349 = vmatprep.subr.bf16.mxu1 %v530_v0 }
  0x11   :  { %470 = vmatprep.subr.bf16.mxu0 %v505_v13  ;;  %94 = vperm.xlu1 %492, %v76_v34  }
  0x13   :  { %350 = vmatpush1.bf16.msra.mxu1 %v506_v14 }
  0x14   :  { %471 = vmatpush3.bf16.msra.mxu0 %v507_v15  ;;  %351 = vmatprep.subr.bf16.mxu1 %v530_v0 }
  0x15   :  { %472 = vmatprep.subr.bf16.mxu0 %v508_v16 }
  0x17   :  { %352 = vmatpush1.bf16.msra.mxu1 %v509_v17 }
  0x18   :  { %473 = vmatpush3.bf16.msra.mxu0 %v510_v18  ;;  %353 = vmatprep.subr.bf16.mxu1 %v530_v0 }
  0x19   :  { %474 = vmatprep.subr.bf16.mxu0 %v511_v19 }
  0x1b   :  { %354 = vmatpush1.bf16.msra.mxu1 %v512_v20 }
  0x1c   :  { %475 = vmatpush3.bf16.msra.mxu0 %v513_v21  ;;  %355 = vmatprep.subr.bf16.mxu1 %v530_v0 }
  0x1d   :  { %476 = vmatprep.subr.bf16.mxu0 %v514_v22 }
  0x1f   :  { %356 = vmatpush1.bf16.msra.mxu1 %v515_v24 }
  0x20   :  { %477 = vmatpush3.bf16.msra.mxu0 %v516_v26  ;;  %357 = vmatprep.subr.bf16.mxu1 %v530_v0 }
  0x23   :  { %325 = vmatmul.mubr.bf16.vlgmr.msra.gmra.mrb[0].mxu0 %v517_v29  ;;  %358 = vmatpush1.bf16.msra.mxu1 %v520_v30 }
  0x24   :  { %332 = vmatprep.mubr.bf16.mxu0 %v524_v31 }
  0x26   :  { %374 = vmatmul.mubr.bf16.vlgmr.msra.gmra.mrb[0].mxu1 %v521_v33 }
  0x27   :  { %453 = vmatprep.mubr.msk.bf16.mxu1 %vm285_vm0, %v527_v35 }
  0x2b   :  { %333 = vmatmul.mubr.bf16.gmra.mrb[4].mxu0 %v526_v36 }
  0x2e   :  { %382 = vmatmul.mubr.bf16.gmra.mrb[4].mxu1 %v529_v37 }
  0x88   :  { %v80_v38 = vpop.permute.xlu0 %79 }
  0x8c   :  { %v90_v53 = vpop.permute.xlu1 %89 }
  0x8d   :  { %v85_v43 = vpop.permute.xlu0 %84 }
  0x90   :  { %v95_v4 = vpop.permute.xlu1 %94 }
  0xf6   :  { %v478_v39 = vpop.f32.mrb[0].mxu0 }
  0xf7   :  { %v479_v40 = vpop.f32.mrb[1].mxu0 }
  0xf8   :  { %v480_v41 = vadd.f32 %v479_v40, %v478_v39  ;;  %v481_v42 = vpop.f32.mrb[2].mxu0 }
  0xf9   :  { %v482_v44 = vpop.f32.mrb[3].mxu0  ;;  %v375_v45 = vpop.f32.mrb[0].mxu1 }
  0xfa   :  { %v483_v46 = vadd.f32 %v482_v44, %v481_v42  ;;  %v327_v47 = vadd.f32 %v480_v41, %v80_v38  ;;  %v377_v48 = vpop.f32.mrb[1].mxu1 }
  0xfb   :  { %v378_v49 = vpop.f32.mrb[2].mxu1 }
  0xfc   :  { %v376_v50 = vadd.f32 %v375_v45, %v327_v47  ;;  %v330_v51 = vadd.f32 %v483_v46, %v85_v43  ;;  %v380_v52 = vpop.f32.mrb[3].mxu1 }
  0xfe   :  { %v390_v54 = vmax.f32 %v376_v50, 0.0  ;;  %v379_v55 = vadd.f32 %v378_v49, %v330_v51  ;;  %v484_v56 = vpop.f32.mrb[4].mxu0 }
  0xff   :  { %v485_v57 = vpop.f32.mrb[5].mxu0 }
 0x100   :  { %v458_v58 = vpack.c.bf16 %v390_v54, %v390_v54  ;;  %v391_v59 = vmax.f32 %v379_v55, 0.0  ;;  %v486_v60 = vadd.f32 %v485_v57, %v484_v56  ;;  %v487_v61 = vpop.f32.mrb[6].mxu0 }
 0x101   :  { %v488_v62 = vpop.f32.mrb[7].mxu0  ;;  %v383_v63 = vpop.f32.mrb[4].mxu1 }
 0x102   :  { %411 = vst.msk [vmem:[%s694_s3] sm:$0xf] %vm410_vm1, %v458_v58  ;;  %v459_v0 = vpack.c.bf16 %v391_v59, %v391_v59  ;;  %v489_v1 = vadd.f32 %v488_v62, %v487_v61  ;;  %v335_v2 = vadd.f32 %v486_v60, %v90_v53  ;;  %v385_v3 = vpop.f32.mrb[5].mxu1 }
 0x103   :  { %v386_v5 = vpop.f32.mrb[6].mxu1 }
 0x104   :  { %412 = vst.msk [vmem:[%s694_s3 + $0x4] sm:$0xf] %vm410_vm1, %v459_v0  ;;  %v384_v6 = vadd.f32 %v383_v63, %v335_v2  ;;  %v338_v7 = vadd.f32 %v489_v1, %v95_v4  ;;  %v388_v8 = vpop.f32.mrb[7].mxu1 }
 0x106   :  { %v392_v9 = vmax.f32 %v384_v6, 0.0  ;;  %v387_v10 = vadd.f32 %v386_v5, %v338_v7 }
 0x108   :  { %v460_v11 = vpack.c.bf16 %v392_v9, %v392_v9  ;;  %v393_v12 = vmax.f32 %v387_v10, 0.0 }
 0x10a   :  { %413 = vst.msk [vmem:[%s694_s3 + $0x8] sm:$0xf] %vm410_vm1, %v460_v11  ;;  %v461_v13 = vpack.c.bf16 %v393_v12, %v393_v12 }
 0x10c   :  { %414 = vst.msk [vmem:[%s694_s3 + $0xc] sm:$0xf] %vm410_vm1, %v461_v13 }

// kernel: feature_net_forward.18
= control target key start
LH: loop header
LB: loop body
LE: loop exit
PB: predicated region body
PF: predicated region fallthrough
CT: control target
= control target key end

     0   :  { %v458_v1 = vmov 0   ;;  %vm221_vm0 = vcmask 261120   ;;  %vm346_vm1 = vcmask 257024   ;;  %s581_s1 = inlined_call_operand.vmem [shape: bf16[288,32], index: 1, kind: input, shape index: {}]   ;;  %s582_s0 = inlined_call_operand.vmem [shape: bf16[32,288], index: 0, kind: input, shape index: {}]   ;;  %s583_s2 = inlined_call_operand.vmem [shape: f32[32,1], index: 2, kind: input, shape index: {}]   ;;  %s584_s3 = inlined_call_operand.vmem [shape: bf16[32,32], index: 3, kind: output, shape index: {}]  }
   0x1   :  { %v432_v0 = vld [vmem:[%s581_s1 + $0x40] sm:$0xff]   ;;  %430 = vset.pattern.permute.xlu0 %v458_v1  ;;  %431 = vset.pattern.permute.xlu1 %v458_v1  ;;  %v434_v3 = vld [vmem:[%s581_s1 + $0x48] sm:$0xff]   ;;  %v436_v5 = vld [vmem:[%s581_s1 + $0x50] sm:$0xff]  }
   0x2   :  { %v433_v2 = vld [vmem:[%s581_s1] sm:$0xff]   ;;  %389 = vmatprep.subr.bf16.mxu0 %v432_v0  ;;  %v435_v4 = vld [vmem:[%s581_s1 + $0x8] sm:$0xff]   ;;  %v437_v6 = vld [vmem:[%s581_s1 + $0x10] sm:$0xff]  }
   0x3   :  { %390 = vmatpush3.bf16.msra.mxu0 %v433_v2  ;;  %v438_v7 = vld [vmem:[%s581_s1 + $0x58] sm:$0xff]   ;;  %v440_v9 = vld [vmem:[%s581_s1 + $0x60] sm:$0xff]   ;;  %v442_v12 = vld [vmem:[%s581_s1 + $0x68] sm:$0xff]  }
   0x4   :  { %391 = vmatprep.subr.bf16.mxu0 %v434_v3  ;;  %v439_v8 = vld [vmem:[%s581_s1 + $0x18] sm:$0xff]   ;;  %v441_v10 = vld [vmem:[%s581_s1 + $0x20] sm:$0xff]   ;;  %v443_v13 = vld [vmem:[%s581_s1 + $0x28] sm:$0xff]  }
   0x5   :  { %v447_v11 = vld [vmem:[%s581_s1 + $0x80] sm:$0xff]   ;;  %v444_v14 = vld [vmem:[%s581_s1 + $0x70] sm:$0xff]   ;;  %v452_v16 = vld [vmem:[%s581_s1 + $0x88] sm:$0xff]  }
   0x6   :  { %421 = vmatprep.subr.bf16.mxu1 %v447_v11  ;;  %v451_v15 = vld [vmem:[%s582_s0 + $0x4] ss:$12 sps:$4 sm:$0xff]   ;;  %v453_v17 = vld [vmem:[%s582_s0 + $0x8] ss:$12 sps:$4 sm:$0xff]   ;;  %v454_v18 = vld [vmem:[%s582_s0 + $0x20] ss:$12 sps:$4 sm:$0xff]  }
   0x7   :  { %392 = vmatpush3.bf16.msra.mxu0 %v435_v4  ;;  %422 = vmatpush3.bf16.msra.mxu1 %v447_v11  ;;  %v59_v19 = vld [vmem:[%s583_s2] sm:$0xff]  ;;  %v445_v20 = vld [vmem:[%s581_s1 + $0x30] sm:$0xff]   ;;  %v446_v22 = vld [vmem:[%s581_s1 + $0x78] sm:$0xff]  }
   0x8   :  { %393 = vmatprep.subr.bf16.mxu0 %v436_v5  ;;  %260 = vmatprep.mubr.bf16.mxu0 %v451_v15  ;;  %v61_v21 = vld [vmem:[%s583_s2 + $0x10] sm:$0xff]  ;;  %v60_v23 = vld [vmem:[%s583_s2 + $0x8] sm:$0xff]  ;;  %v62_v24 = vld [vmem:[%s583_s2 + $0x18] sm:$0xff] }
   0x9   :  { %423 = vmatprep.subr.bf16.mxu1 %v452_v16  ;;  %425 = vmatprep.mubr.msk.bf16.mxu1 %vm221_vm0, %v453_v17  ;;  %v448_v25 = vld [vmem:[%s581_s1 + $0x38] sm:$0xff]   ;;  %v449_v26 = vld [vmem:[%s582_s0] ss:$12 sps:$4 sm:$0xff]  }
   0xa   :  { %65 = vperm.xlu0 %430, %v59_v19   ;;  %75 = vperm.xlu1 %431, %v61_v21   ;;  %v455_v27 = vld [vmem:[%s582_s0 + $0x1c] ss:$12 sps:$4 sm:$0xff]   ;;  %v457_v28 = vld [vmem:[%s582_s0 + $0x18] ss:$12 sps:$4 sm:$0xff]  }
   0xb   :  { %394 = vmatpush3.bf16.msra.mxu0 %v437_v6  ;;  %424 = vmatpush3.bf16.msra.mxu1 %v452_v16 }
   0xc   :  { %395 = vmatprep.subr.bf16.mxu0 %v438_v7 }
   0xe   :  { %426 = vmatmul.mubr.msk.bf16.vlgmr.msra.gmra.mrb[0].mxu1 %vm221_vm0, %v454_v18  ;;  %70 = vperm.xlu0 %430, %v60_v23  }
   0xf   :  { %396 = vmatpush3.bf16.msra.mxu0 %v439_v8  ;;  %80 = vperm.xlu1 %431, %v62_v24  }
  0x10   :  { %397 = vmatprep.subr.bf16.mxu0 %v440_v9 }
  0x13   :  { %398 = vmatpush3.bf16.msra.mxu0 %v441_v10 }
  0x14   :  { %399 = vmatprep.subr.bf16.mxu0 %v442_v12 }
  0x17   :  { %400 = vmatpush3.bf16.msra.mxu0 %v443_v13 }
  0x18   :  { %401 = vmatprep.subr.bf16.mxu0 %v444_v14 }
  0x1b   :  { %402 = vmatpush3.bf16.msra.mxu0 %v445_v20 }
  0x1c   :  { %403 = vmatprep.subr.bf16.mxu0 %v446_v22 }
  0x1f   :  { %404 = vmatpush3.bf16.msra.mxu0 %v448_v25 }
  0x22   :  { %261 = vmatmul.mubr.bf16.vlgmr.msra.gmra.mrb[0].mxu0 %v449_v26 }
  0x23   :  { %268 = vmatprep.mubr.bf16.mxu0 %v455_v27 }
  0x2a   :  { %269 = vmatmul.mubr.bf16.gmra.mrb[4].mxu0 %v457_v28 }
  0x89   :  { %v66_v33 = vpop.permute.xlu0 %65  ;;  %v76_v44 = vpop.permute.xlu1 %75 }
  0x8d   :  { %v71_v39 = vpop.permute.xlu0 %70 }
  0x8e   :  { %v81_v57 = vpop.permute.xlu1 %80 }
  0xe1   :  { %v427_v29 = vpop.f32.mrb[0].mxu1 }
  0xe2   :  { %v311_v30 = vpop.f32.mrb[1].mxu1 }
  0xe3   :  { %v428_v31 = vpop.f32.mrb[2].mxu1 }
  0xe4   :  { %v314_v32 = vpop.f32.mrb[3].mxu1 }
  0xf5   :  { %v405_v34 = vpop.f32.mrb[0].mxu0 }
  0xf6   :  { %v406_v35 = vpop.f32.mrb[1].mxu0 }
  0xf7   :  { %v407_v36 = vadd.f32 %v406_v35, %v405_v34  ;;  %v408_v37 = vpop.f32.mrb[2].mxu0 }
  0xf8   :  { %v409_v38 = vpop.f32.mrb[3].mxu0 }
  0xf9   :  { %v410_v40 = vadd.f32 %v409_v38, %v408_v37  ;;  %v263_v41 = vadd.f32 %v407_v36, %v66_v33 }
  0xfb   :  { %v266_v42 = vadd.f32 %v410_v40, %v71_v39  ;;  %v312_v43 = vadd.f32 %v311_v30, %v263_v41 }
  0xfd   :  { %v326_v45 = vmax.f32 %v312_v43, 0.0  ;;  %v315_v46 = vadd.f32 %v314_v32, %v266_v42  ;;  %v411_v47 = vpop.f32.mrb[4].mxu0 }
  0xfe   :  { %v412_v48 = vpop.f32.mrb[5].mxu0 }
  0xff   :  { %v385_v49 = vpack.c.bf16 %v326_v45, %v326_v45  ;;  %v327_v50 = vmax.f32 %v315_v46, 0.0  ;;  %v413_v51 = vadd.f32 %v412_v48, %v411_v47  ;;  %v414_v52 = vpop.f32.mrb[6].mxu0 }
 0x100   :  { %v415_v53 = vpop.f32.mrb[7].mxu0 }
 0x101   :  { %347 = vst.msk [vmem:[%s584_s3] sm:$0xf] %vm346_vm1, %v385_v49  ;;  %v386_v54 = vpack.c.bf16 %v327_v50, %v327_v50  ;;  %v271_v55 = vadd.f32 %v413_v51, %v76_v44  ;;  %v416_v56 = vadd.f32 %v415_v53, %v414_v52 }
 0x103   :  { %348 = vst.msk [vmem:[%s584_s3 + $0x4] sm:$0xf] %vm346_vm1, %v386_v54  ;;  %v320_v58 = vadd.f32 %v427_v29, %v271_v55  ;;  %v274_v59 = vadd.f32 %v416_v56, %v81_v57 }
 0x105   :  { %v328_v60 = vmax.f32 %v320_v58, 0.0  ;;  %v323_v61 = vadd.f32 %v428_v31, %v274_v59 }
 0x107   :  { %v387_v62 = vpack.c.bf16 %v328_v60, %v328_v60  ;;  %v329_v63 = vmax.f32 %v323_v61, 0.0 }
 0x109   :  { %349 = vst.msk [vmem:[%s584_s3 + $0x8] sm:$0xf] %vm346_vm1, %v387_v62  ;;  %v388_v0 = vpack.c.bf16 %v329_v63, %v329_v63 }
 0x10b   :  { %350 = vst.msk [vmem:[%s584_s3 + $0xc] sm:$0xf] %vm346_vm1, %v388_v0 }

// kernel: feature_net_forward.20
= control target key start
LH: loop header
LB: loop body
LE: loop exit
PB: predicated region body
PF: predicated region fallthrough
CT: control target
= control target key end

     0   :  { %v1306_v1 = vmov 0   ;;  %vm635_vm0 = vcmask 261120   ;;  %vm948_vm1 = vcmask 60416   ;;  %s1639_s1 = inlined_call_operand.vmem [shape: bf16[800,8], index: 1, kind: input, shape index: {}]   ;;  %s1640_s0 = inlined_call_operand.vmem [shape: bf16[64,800], index: 0, kind: input, shape index: {}]   ;;  %s1641_s2 = inlined_call_operand.vmem [shape: f32[64,1], index: 2, kind: input, shape index: {}]   ;;  %s1642_s3 = inlined_call_operand.vmem [shape: bf16[64,8], index: 3, kind: output, shape index: {}]  }
   0x1   :  { %v1216_v0 = vld [vmem:[%s1639_s1 + $0x40] sm:$0xff]   ;;  %1214 = vset.pattern.permute.xlu0 %v1306_v1  ;;  %1215 = vset.pattern.permute.xlu1 %v1306_v1  ;;  %v1220_v5 = vld [vmem:[%s1639_s1 + $0x48] sm:$0xff]   ;;  %v1224_v9 = vld [vmem:[%s1639_s1 + $0x50] sm:$0xff]  }
   0x2   :  { %v1217_v2 = vld [vmem:[%s1639_s1 + $0xc0] sm:$0xff]   ;;  %1059 = vmatprep.subr.bf16.mxu0 %v1216_v0  ;;  %v1221_v6 = vld [vmem:[%s1639_s1 + $0xc8] sm:$0xff]   ;;  %v1225_v10 = vld [vmem:[%s1639_s1 + $0xd0] sm:$0xff]  }
   0x3   :  { %v1218_v3 = vld [vmem:[%s1639_s1] sm:$0xff]   ;;  %1099 = vmatprep.subr.bf16.mxu1 %v1217_v2  ;;  %v1222_v7 = vld [vmem:[%s1639_s1 + $0x8] sm:$0xff]   ;;  %v1226_v11 = vld [vmem:[%s1639_s1 + $0x10] sm:$0xff]  }
   0x4   :  { %v1219_v4 = vld [vmem:[%s1639_s1 + $0x80] sm:$0xff]   ;;  %1060 = vmatpush3.bf16.msra.mxu0 %v1218_v3  ;;  %v1223_v8 = vld [vmem:[%s1639_s1 + $0x88] sm:$0xff]   ;;  %v1227_v12 = vld [vmem:[%s1639_s1 + $0x90] sm:$0xff]  }
   0x5   :  { %1100 = vmatpush3.bf16.msra.mxu1 %v1219_v4  ;;  %1061 = vmatprep.subr.bf16.mxu0 %v1220_v5  ;;  %v1228_v13 = vld [vmem:[%s1639_s1 + $0x58] sm:$0xff]   ;;  %v1232_v17 = vld [vmem:[%s1639_s1 + $0x60] sm:$0xff]   ;;  %v1236_v21 = vld [vmem:[%s1639_s1 + $0x68] sm:$0xff]  }
   0x6   :  { %1101 = vmatprep.subr.bf16.mxu1 %v1221_v6  ;;  %v1229_v14 = vld [vmem:[%s1639_s1 + $0xd8] sm:$0xff]   ;;  %v1233_v18 = vld [vmem:[%s1639_s1 + $0xe0] sm:$0xff]   ;;  %v1237_v22 = vld [vmem:[%s1639_s1 + $0xe8] sm:$0xff]  }
   0x7   :  { %v1230_v15 = vld [vmem:[%s1639_s1 + $0x18] sm:$0xff]   ;;  %v1234_v19 = vld [vmem:[%s1639_s1 + $0x20] sm:$0xff]   ;;  %v1238_v23 = vld [vmem:[%s1639_s1 + $0x28] sm:$0xff]  }
   0x8   :  { %1062 = vmatpush3.bf16.msra.mxu0 %v1222_v7  ;;  %v1231_v16 = vld [vmem:[%s1639_s1 + $0x98] sm:$0xff]   ;;  %v1235_v20 = vld [vmem:[%s1639_s1 + $0xa0] sm:$0xff]   ;;  %v1239_v24 = vld [vmem:[%s1639_s1 + $0xa8] sm:$0xff]  }
   0x9   :  { %1102 = vmatpush3.bf16.msra.mxu1 %v1223_v8  ;;  %1063 = vmatprep.subr.bf16.mxu0 %v1224_v9  ;;  %v1240_v25 = vld [vmem:[%s1639_s1 + $0x70] sm:$0xff]   ;;  %v1244_v29 = vld [vmem:[%s1639_s1 + $0x78] sm:$0xff]   ;;  %v1250_v34 = vld [vmem:[%s1640_s0 + $0x4] ss:$28 sps:$4 sm:$0xff]  }
   0xa   :  { %1103 = vmatprep.subr.bf16.mxu1 %v1225_v10  ;;  %v1241_v26 = vld [vmem:[%s1639_s1 + $0xf0] sm:$0xff]   ;;  %v1245_v30 = vld [vmem:[%s1639_s1 + $0xf8] sm:$0xff]   ;;  %v1251_v35 = vld [vmem:[%s1640_s0 + $0x8] ss:$28 sps:$4 sm:$0xff]   ;;  %680 = vmatprep.mubr.bf16.mxu0 %v1250_v34 }
   0xb   :  { %v1242_v27 = vld [vmem:[%s1639_s1 + $0x30] sm:$0xff]   ;;  %v1246_v31 = vld [vmem:[%s1639_s1 + $0x38] sm:$0xff]   ;;  %v1253_v36 = vld [vmem:[%s1640_s0 + $0xc] ss:$28 sps:$4 sm:$0xff]  }
   0xc   :  { %1064 = vmatpush3.bf16.msra.mxu0 %v1226_v11  ;;  %v1243_v28 = vld [vmem:[%s1639_s1 + $0xb0] sm:$0xff]   ;;  %v1247_v32 = vld [vmem:[%s1639_s1 + $0xb8] sm:$0xff]   ;;  %v1254_v37 = vld [vmem:[%s1639_s1 + $0x140] sm:$0xff]   ;;  %745 = vmatprep.mubr.bf16.mxu1 %v1253_v36 }
   0xd   :  { %1104 = vmatpush3.bf16.msra.mxu1 %v1227_v12  ;;  %1065 = vmatprep.subr.bf16.mxu0 %v1228_v13  ;;  %v1248_v33 = vld [vmem:[%s1640_s0] ss:$28 sps:$4 sm:$0xff]   ;;  %v1256_v39 = vld [vmem:[%s1639_s1 + $0x148] sm:$0xff]   ;;  %v1262_v43 = vld [vmem:[%s1640_s0 + $0x38] ss:$28 sps:$4 sm:$0xff]  }
   0xe   :  { %1105 = vmatprep.subr.bf16.mxu1 %v1229_v14  ;;  %v1255_v38 = vld [vmem:[%s1639_s1 + $0x100] sm:$0xff]   ;;  %v1257_v40 = vld [vmem:[%s1639_s1 + $0x108] sm:$0xff]   ;;  %v1258_v41 = vld [vmem:[%s1640_s0 + $0x3c] ss:$28 sps:$4 sm:$0xff]  }
   0xf   :  { %v1260_v42 = vld [vmem:[%s1640_s0 + $0x44] ss:$28 sps:$4 sm:$0xff]   ;;  %v1264_v45 = vld [vmem:[%s1639_s1 + $0x150] sm:$0xff]   ;;  %v1266_v47 = vld [vmem:[%s1639_s1 + $0x158] sm:$0xff]  }
  0x10   :  { %1066 = vmatpush3.bf16.msra.mxu0 %v1230_v15  ;;  %v1263_v44 = vld [vmem:[%s1640_s0 + $0x40] ss:$28 sps:$4 sm:$0xff]   ;;  %v1265_v46 = vld [vmem:[%s1639_s1 + $0x110] sm:$0xff]   ;;  %v1276_v55 = vld [vmem:[%s1639_s1 + $0x168] sm:$0xff]  }
  0x11   :  { %1106 = vmatpush3.bf16.msra.mxu1 %v1231_v16  ;;  %1067 = vmatprep.subr.bf16.mxu0 %v1232_v17  ;;  %v1267_v48 = vld [vmem:[%s1639_s1 + $0x118] sm:$0xff]   ;;  %v1268_v49 = vld [vmem:[%s1640_s0 + $0x74] ss:$28 sps:$4 sm:$0xff]   ;;  %v1274_v52 = vld [vmem:[%s1639_s1 + $0x160] sm:$0xff]  }
  0x12   :  { %1107 = vmatprep.subr.bf16.mxu1 %v1233_v18  ;;  %v1270_v50 = vld [vmem:[%s1640_s0 + $0x7c] ss:$28 sps:$4 sm:$0xff]   ;;  %v1272_v51 = vld [vmem:[%s1640_s0 + $0x70] ss:$28 sps:$4 sm:$0xff]   ;;  %v1275_v54 = vld [vmem:[%s1639_s1 + $0x120] sm:$0xff]  }
  0x13   :  { %v1273_v53 = vld [vmem:[%s1640_s0 + $0x78] ss:$28 sps:$4 sm:$0xff]   ;;  %v1278_v56 = vld [vmem:[%s1640_s0 + $0xac] ss:$28 sps:$4 sm:$0xff]   ;;  %v1294_v3 = vld [vmem:[%s1639_s1 + $0x180] sm:$0xff]  }
  0x14   :  { %1068 = vmatpush3.bf16.msra.mxu0 %v1234_v19  ;;  %v1280_v57 = vld [vmem:[%s1640_s0 + $0xb4] ss:$28 sps:$4 sm:$0xff]   ;;  %v1277_v58 = vld [vmem:[%s1639_s1 + $0x128] sm:$0xff]   ;;  %v1286_v63 = vld [vmem:[%s1639_s1 + $0x178] sm:$0xff]  }
  0x15   :  { %1108 = vmatpush3.bf16.msra.mxu1 %v1235_v20  ;;  %1069 = vmatprep.subr.bf16.mxu0 %v1236_v21  ;;  %v1284_v59 = vld [vmem:[%s1639_s1 + $0x170] sm:$0xff]   ;;  %v1282_v60 = vld [vmem:[%s1640_s0 + $0xa8] ss:$28 sps:$4 sm:$0xff]   ;;  %v1293_v1 = vld [vmem:[%s1640_s0 + $0xbc] ss:$28 sps:$4 sm:$0xff]  }
  0x16   :  { %1109 = vmatprep.subr.bf16.mxu1 %v1237_v22  ;;  %v1283_v61 = vld [vmem:[%s1640_s0 + $0xb0] ss:$28 sps:$4 sm:$0xff]   ;;  %v1287_v2 = vld [vmem:[%s1639_s1 + $0x138] sm:$0xff]   ;;  %v147_v9 = vld [vmem:[%s1641_s2] sm:$0xff] }
  0x17   :  { %v1285_v62 = vld [vmem:[%s1639_s1 + $0x130] sm:$0xff]   ;;  %v1296_v6 = vld [vmem:[%s1640_s0 + $0x4c] ss:$28 sps:$4 sm:$0xff]   ;;  %157 = vperm.xlu0 %1214, %v147_v9   ;;  %v1301_v14 = vld [vmem:[%s1640_s0 + $0x84] ss:$28 sps:$4 sm:$0xff]  }
  0x18   :  { %1070 = vmatpush3.bf16.msra.mxu0 %v1238_v23  ;;  %v1290_v0 = vld [vmem:[%s1640_s0 + $0x14] ss:$28 sps:$4 sm:$0xff]   ;;  %v1295_v8 = vld [vmem:[%s1639_s1 + $0x188] sm:$0xff]   ;;  %v150_v15 = vld [vmem:[%s1641_s2 + $0x18] sm:$0xff] }
  0x19   :  { %1110 = vmatpush3.bf16.msra.mxu1 %v1239_v24  ;;  %1071 = vmatprep.subr.bf16.mxu0 %v1240_v25  ;;  %v1288_v4 = vld [vmem:[%s1640_s0 + $0x10] ss:$28 sps:$4 sm:$0xff]   ;;  %v1291_v5 = vld [vmem:[%s1640_s0 + $0xb8] ss:$28 sps:$4 sm:$0xff]   ;;  %v1299_v11 = vld [vmem:[%s1640_s0 + $0x48] ss:$28 sps:$4 sm:$0xff]  }
  0x1a   :  { %1111 = vmatprep.subr.bf16.mxu1 %v1241_v26  ;;  %v1298_v7 = vld [vmem:[%s1640_s0 + $0x18] ss:$28 sps:$4 sm:$0xff]   ;;  %v148_v12 = vld [vmem:[%s1641_s2 + $0x8] sm:$0xff]  ;;  %v151_v17 = vld [vmem:[%s1641_s2 + $0x20] sm:$0xff] }
  0x1b   :  { %v149_v10 = vld [vmem:[%s1641_s2 + $0x10] sm:$0xff]  ;;  %v1303_v16 = vld [vmem:[%s1640_s0 + $0x88] ss:$28 sps:$4 sm:$0xff]   ;;  %162 = vperm.xlu0 %1214, %v148_v12   ;;  %v1304_v19 = vld [vmem:[%s1640_s0 + $0x80] ss:$28 sps:$4 sm:$0xff]  }
  0x1c   :  { %1072 = vmatpush3.bf16.msra.mxu0 %v1242_v27  ;;  %167 = vperm.xlu1 %1215, %v149_v10   ;;  %v1300_v13 = vld [vmem:[%s1640_s0 + $0x50] ss:$28 sps:$4 sm:$0xff]   ;;  %v1305_v21 = vld [vmem:[%s1640_s0 + $0xc0] ss:$28 sps:$4 sm:$0xff]  }
  0x1d   :  { %1112 = vmatpush3.bf16.msra.mxu1 %v1243_v28  ;;  %1073 = vmatprep.subr.bf16.mxu0 %v1244_v29  ;;  %v152_v18 = vld [vmem:[%s1641_s2 + $0x28] sm:$0xff]  ;;  %v153_v20 = vld [vmem:[%s1641_s2 + $0x30] sm:$0xff]  ;;  %v154_v22 = vld [vmem:[%s1641_s2 + $0x38] sm:$0xff] }
  0x1e   :  { %1113 = vmatprep.subr.bf16.mxu1 %v1245_v30 }
  0x1f   :  { %177 = vperm.xlu0 %1214, %v151_v17  }
  0x20   :  { %1074 = vmatpush3.bf16.msra.mxu0 %v1246_v31  ;;  %172 = vperm.xlu1 %1215, %v150_v15  }
  0x21   :  { %1114 = vmatpush3.bf16.msra.mxu1 %v1247_v32  ;;  %1139 = vmatprep.subr.bf16.mxu0 %v1254_v37 }
  0x22   :  { %1197 = vmatprep.subr.bf16.mxu1 %v1254_v37 }
  0x23   :  { %681 = vmatmul.mubr.bf16.vlgmr.msra.gmra.mrb[0].mxu0 %v1248_v33  ;;  %187 = vperm.xlu0 %1214, %v153_v20  }
  0x24   :  { %746 = vmatmul.mubr.bf16.vlgmr.msra.gmra.mrb[0].mxu1 %v1251_v35  ;;  %1140 = vmatpush3.bf16.msra.mxu0 %v1255_v38 }
  0x25   :  { %1205 = vmatpush3.bf16.msra.mxu1 %v1255_v38  ;;  %1141 = vmatprep.subr.bf16.mxu0 %v1256_v39 }
  0x26   :  { %1198 = vmatprep.subr.bf16.mxu1 %v1256_v39  ;;  %688 = vmatprep.mubr.bf16.mxu0 %v1258_v41 }
  0x27   :  { %753 = vmatprep.mubr.bf16.mxu1 %v1260_v42  ;;  %182 = vperm.xlu1 %1215, %v152_v18  }
  0x28   :  { %1142 = vmatpush3.bf16.msra.mxu0 %v1257_v40 }
  0x29   :  { %1206 = vmatpush3.bf16.msra.mxu1 %v1257_v40  ;;  %1143 = vmatprep.subr.bf16.mxu0 %v1264_v45 }
  0x2a   :  { %1199 = vmatprep.subr.bf16.mxu1 %v1264_v45 }
  0x2b   :  { %689 = vmatmul.mubr.bf16.gmra.mrb[4].mxu0 %v1262_v43  ;;  %192 = vperm.xlu1 %1215, %v154_v22  }
  0x2c   :  { %754 = vmatmul.mubr.bf16.gmra.mrb[4].mxu1 %v1263_v44  ;;  %1144 = vmatpush3.bf16.msra.mxu0 %v1265_v46 }
  0x2d   :  { %1207 = vmatpush3.bf16.msra.mxu1 %v1265_v46  ;;  %1145 = vmatprep.subr.bf16.mxu0 %v1266_v47 }
  0x2e   :  { %1200 = vmatprep.subr.bf16.mxu1 %v1266_v47  ;;  %696 = vmatprep.mubr.bf16.mxu0 %v1268_v49 }
  0x2f   :  { %761 = vmatprep.mubr.bf16.mxu1 %v1270_v50 }
  0x30   :  { %1146 = vmatpush3.bf16.msra.mxu0 %v1267_v48 }
  0x31   :  { %1208 = vmatpush3.bf16.msra.mxu1 %v1267_v48  ;;  %1147 = vmatprep.subr.bf16.mxu0 %v1274_v52 }
  0x32   :  { %1201 = vmatprep.subr.bf16.mxu1 %v1274_v52 }
  0x33   :  { %697 = vmatmul.mubr.bf16.gmra.mrb[8].mxu0 %v1272_v51 }
  0x34   :  { %762 = vmatmul.mubr.bf16.gmra.mrb[8].mxu1 %v1273_v53  ;;  %1148 = vmatpush3.bf16.msra.mxu0 %v1275_v54 }
  0x35   :  { %704 = vmatprep.mubr.bf16.mxu0 %v1278_v56  ;;  %1209 = vmatpush3.bf16.msra.mxu1 %v1275_v54 }
  0x36   :  { %1149 = vmatprep.subr.bf16.mxu0 %v1276_v55  ;;  %1202 = vmatprep.subr.bf16.mxu1 %v1276_v55 }
  0x37   :  { %769 = vmatprep.mubr.bf16.mxu1 %v1280_v57 }
  0x38   :  { %1150 = vmatpush3.bf16.msra.mxu0 %v1277_v58 }
  0x39   :  { %1210 = vmatpush3.bf16.msra.mxu1 %v1277_v58  ;;  %1151 = vmatprep.subr.bf16.mxu0 %v1284_v59 }
  0x3a   :  { %1203 = vmatprep.subr.bf16.mxu1 %v1284_v59 }
  0x3b   :  { %705 = vmatmul.mubr.bf16.gmra.mrb[12].mxu0 %v1282_v60 }
  0x3c   :  { %770 = vmatmul.mubr.bf16.gmra.mrb[12].mxu1 %v1283_v61  ;;  %810 = vmatprep.mubr.bf16.mxu0 %v1290_v0 }
  0x3d   :  { %1152 = vmatpush3.bf16.msra.mxu0 %v1285_v62  ;;  %1211 = vmatpush3.bf16.msra.mxu1 %v1285_v62 }
  0x3e   :  { %1153 = vmatprep.subr.bf16.mxu0 %v1286_v63  ;;  %1204 = vmatprep.subr.bf16.mxu1 %v1286_v63 }
  0x3f   :  { %834 = vmatprep.mubr.bf16.mxu1 %v1293_v1 }
  0x41   :  { %1154 = vmatpush3.bf16.msra.mxu0 %v1287_v2  ;;  %1212 = vmatpush3.bf16.msra.mxu1 %v1287_v2 }
  0x42   :  { %1185 = vmatprep.subr.bf16.mxu1 %v1294_v3 }
  0x44   :  { %811 = vmatmul.mubr.bf16.vlgmr.msra.gmra.mrb[16].mxu0 %v1288_v4  ;;  %835 = vmatmul.mubr.bf16.vlgmr.msra.gmra.mrb[16].mxu1 %v1291_v5 }
  0x45   :  { %818 = vmatprep.mubr.bf16.mxu0 %v1296_v6  ;;  %1186 = vmatpush3.bf16.msra.mxu1 %v1294_v3 }
  0x46   :  { %1189 = vmatprep.mubr.msk.bf16.mxu1 %vm635_vm0, %v1298_v7  ;;  %1187 = vmatprep.subr.bf16.mxu1 %v1295_v8 }
  0x49   :  { %1188 = vmatpush3.bf16.msra.mxu1 %v1295_v8 }
  0x4c   :  { %819 = vmatmul.mubr.bf16.gmra.mrb[20].mxu0 %v1299_v11  ;;  %1190 = vmatmul.mubr.msk.bf16.vlgmr.msra.gmra.mrb[20].mxu1 %vm635_vm0, %v1300_v13 }
  0x4d   :  { %826 = vmatprep.mubr.bf16.mxu0 %v1301_v14  ;;  %1193 = vmatprep.mubr.msk.bf16.mxu1 %vm635_vm0, %v1303_v16 }
  0x54   :  { %827 = vmatmul.mubr.bf16.gmra.mrb[24].mxu0 %v1304_v19  ;;  %1194 = vmatmul.mubr.msk.bf16.gmra.mrb[24].mxu1 %vm635_vm0, %v1305_v21 }
  0x96   :  { %v158_v23 = vpop.permute.xlu0 %157 }
  0x9a   :  { %v163_v26 = vpop.permute.xlu0 %162 }
  0x9b   :  { %v168_v24 = vpop.permute.xlu1 %167 }
  0x9e   :  { %v178_v58 = vpop.permute.xlu0 %177 }
  0x9f   :  { %v173_v43 = vpop.permute.xlu1 %172 }
  0xa2   :  { %v188_v12 = vpop.permute.xlu0 %187 }
  0xa6   :  { %v183_v61 = vpop.permute.xlu1 %182 }
  0xaa   :  { %v193_v15 = vpop.permute.xlu1 %192 }
  0xf6   :  { %v1075_v25 = vpop.f32.mrb[0].mxu0 }
  0xf7   :  { %v1076_v27 = vpop.f32.mrb[1].mxu0  ;;  %v1115_v28 = vpop.f32.mrb[0].mxu1 }
  0xf8   :  { %v1077_v29 = vadd.f32 %v1076_v27, %v1075_v25  ;;  %v1078_v30 = vpop.f32.mrb[2].mxu0  ;;  %v1116_v31 = vpop.f32.mrb[1].mxu1 }
  0xf9   :  { %v1079_v32 = vpop.f32.mrb[3].mxu0  ;;  %v1117_v33 = vadd.f32 %v1116_v31, %v1115_v28  ;;  %v1118_v34 = vpop.f32.mrb[2].mxu1 }
  0xfa   :  { %v683_v35 = vadd.f32 %v1077_v29, %v158_v23  ;;  %v1080_v36 = vadd.f32 %v1079_v32, %v1078_v30  ;;  %v1119_v37 = vpop.f32.mrb[3].mxu1 }
  0xfb   :  { %v1120_v38 = vadd.f32 %v1119_v37, %v1118_v34 }
  0xfc   :  { %v1589_v39 = vadd.f32 %v1117_v33, %v683_v35  ;;  %v686_v40 = vadd.f32 %v1080_v36, %v163_v26 }
  0xfe   :  { %v1591_v41 = vadd.f32 %v1120_v38, %v686_v40  ;;  %v1081_v42 = vpop.f32.mrb[4].mxu0 }
  0xff   :  { %v1082_v44 = vpop.f32.mrb[5].mxu0  ;;  %v1121_v45 = vpop.f32.mrb[4].mxu1 }
 0x100   :  { %v1083_v46 = vadd.f32 %v1082_v44, %v1081_v42  ;;  %v1084_v47 = vpop.f32.mrb[6].mxu0  ;;  %v1122_v48 = vpop.f32.mrb[5].mxu1 }
 0x101   :  { %v1085_v49 = vpop.f32.mrb[7].mxu0  ;;  %v1123_v50 = vadd.f32 %v1122_v48, %v1121_v45  ;;  %v1124_v51 = vpop.f32.mrb[6].mxu1 }
 0x102   :  { %v691_v52 = vadd.f32 %v1083_v46, %v168_v24  ;;  %v1086_v53 = vadd.f32 %v1085_v49, %v1084_v47  ;;  %v1125_v54 = vpop.f32.mrb[7].mxu1 }
 0x103   :  { %v1126_v55 = vadd.f32 %v1125_v54, %v1124_v51 }
 0x104   :  { %v1593_v56 = vadd.f32 %v1123_v50, %v691_v52  ;;  %v694_v57 = vadd.f32 %v1086_v53, %v173_v43 }
 0x106   :  { %v1595_v59 = vadd.f32 %v1126_v55, %v694_v57  ;;  %v1087_v60 = vpop.f32.mrb[8].mxu0 }
 0x107   :  { %v1088_v62 = vpop.f32.mrb[9].mxu0  ;;  %v1127_v63 = vpop.f32.mrb[8].mxu1 }
 0x108   :  { %v1089_v0 = vadd.f32 %v1088_v62, %v1087_v60  ;;  %v1090_v1 = vpop.f32.mrb[10].mxu0  ;;  %v1128_v2 = vpop.f32.mrb[9].mxu1 }
 0x109   :  { %v1091_v3 = vpop.f32.mrb[11].mxu0  ;;  %v1129_v4 = vadd.f32 %v1128_v2, %v1127_v63  ;;  %v1130_v5 = vpop.f32.mrb[10].mxu1 }
 0x10a   :  { %v699_v6 = vadd.f32 %v1089_v0, %v178_v58  ;;  %v1092_v7 = vadd.f32 %v1091_v3, %v1090_v1  ;;  %v1131_v8 = vpop.f32.mrb[11].mxu1 }
 0x10b   :  { %v1132_v9 = vadd.f32 %v1131_v8, %v1130_v5 }
 0x10c   :  { %v1597_v10 = vadd.f32 %v1129_v4, %v699_v6  ;;  %v702_v11 = vadd.f32 %v1092_v7, %v183_v61 }
 0x10e   :  { %v1599_v13 = vadd.f32 %v1132_v9, %v702_v11  ;;  %v1093_v14 = vpop.f32.mrb[12].mxu0 }
 0x10f   :  { %v1094_v16 = vpop.f32.mrb[13].mxu0  ;;  %v1133_v17 = vpop.f32.mrb[12].mxu1 }
 0x110   :  { %v1095_v18 = vadd.f32 %v1094_v16, %v1093_v14  ;;  %v1096_v19 = vpop.f32.mrb[14].mxu0  ;;  %v1134_v20 = vpop.f32.mrb[13].mxu1 }
 0x111   :  { %v1097_v21 = vpop.f32.mrb[15].mxu0  ;;  %v1135_v22 = vadd.f32 %v1134_v20, %v1133_v17  ;;  %v1136_v23 = vpop.f32.mrb[14].mxu1 }
 0x112   :  { %v707_v24 = vadd.f32 %v1095_v18, %v188_v12  ;;  %v1098_v25 = vadd.f32 %v1097_v21, %v1096_v19  ;;  %v1137_v26 = vpop.f32.mrb[15].mxu1 }
 0x113   :  { %v1138_v27 = vadd.f32 %v1137_v26, %v1136_v23 }
 0x114   :  { %v772_v28 = vadd.f32 %v1135_v22, %v707_v24  ;;  %v710_v29 = vadd.f32 %v1098_v25, %v193_v15 }
 0x116   :  { %v775_v30 = vadd.f32 %v1138_v27, %v710_v29 }
 0x117   :  { %v1155_v31 = vpop.f32.mrb[16].mxu0  ;;  %v1173_v32 = vpop.f32.mrb[16].mxu1 }
 0x118   :  { %v1156_v33 = vpop.f32.mrb[17].mxu0  ;;  %v1174_v35 = vpop.f32.mrb[17].mxu1 }
 0x119   :  { %v1157_v34 = vadd.f32 %v1156_v33, %v1155_v31  ;;  %v1158_v36 = vpop.f32.mrb[18].mxu0  ;;  %v1175_v37 = vadd.f32 %v1174_v35, %v1173_v32  ;;  %v1176_v38 = vpop.f32.mrb[18].mxu1 }
 0x11a   :  { %v1159_v40 = vpop.f32.mrb[19].mxu0  ;;  %v1177_v43 = vpop.f32.mrb[19].mxu1 }
 0x11b   :  { %v1160_v42 = vadd.f32 %v1159_v40, %v1158_v36  ;;  %v813_v44 = vadd.f32 %v1157_v34, %v1589_v39  ;;  %v1178_v45 = vadd.f32 %v1177_v43, %v1176_v38  ;;  %v837_v46 = vadd.f32 %v1175_v37, %v772_v28 }
 0x11d   :  { %v816_v47 = vadd.f32 %v1160_v42, %v1591_v41  ;;  %v840_v48 = vadd.f32 %v1178_v45, %v775_v30 }
 0x11f   :  { %v1161_v49 = vpop.f32.mrb[20].mxu0  ;;  %v1191_v50 = vpop.f32.mrb[20].mxu1 }
 0x120   :  { %v1162_v51 = vpop.f32.mrb[21].mxu0  ;;  %v877_v53 = vpop.f32.mrb[21].mxu1 }
 0x121   :  { %v1163_v52 = vadd.f32 %v1162_v51, %v1161_v49  ;;  %v1164_v54 = vpop.f32.mrb[22].mxu0  ;;  %v878_v55 = vadd.f32 %v877_v53, %v813_v44  ;;  %v1192_v57 = vpop.f32.mrb[22].mxu1 }
 0x122   :  { %v1165_v58 = vpop.f32.mrb[23].mxu0  ;;  %v880_v62 = vpop.f32.mrb[23].mxu1 }
 0x123   :  { %v821_v60 = vadd.f32 %v1163_v52, %v1593_v56  ;;  %v1166_v61 = vadd.f32 %v1165_v58, %v1164_v54  ;;  %v908_v63 = vmax.f32 %v878_v55, 0.0  ;;  %v881_v39 = vadd.f32 %v880_v62, %v816_v47 }
 0x125   :  { %v886_v0 = vadd.f32 %v1191_v50, %v821_v60  ;;  %v824_v41 = vadd.f32 %v1166_v61, %v1595_v59  ;;  %v1051_v1 = vpack.c.bf16 %v908_v63, %v908_v63  ;;  %v909_v2 = vmax.f32 %v881_v39, 0.0 }
 0x127   :  { %v910_v3 = vmax.f32 %v886_v0, 0.0  ;;  %v889_v4 = vadd.f32 %v1192_v57, %v824_v41  ;;  %v1167_v5 = vpop.f32.mrb[24].mxu0  ;;  %949 = vst.msk [vmem:[%s1642_s3] sm:$0xf] %vm948_vm1, %v1051_v1  ;;  %v1052_v6 = vpack.c.bf16 %v909_v2, %v909_v2  ;;  %v1195_v56 = vpop.f32.mrb[24].mxu1 }
 0x128   :  { %v1168_v7 = vpop.f32.mrb[25].mxu0  ;;  %v902_v11 = vadd.f32 %v1195_v56, %v837_v46  ;;  %v893_v14 = vpop.f32.mrb[25].mxu1 }
 0x129   :  { %v1053_v8 = vpack.c.bf16 %v910_v3, %v910_v3  ;;  %v911_v9 = vmax.f32 %v889_v4, 0.0  ;;  %v1169_v12 = vadd.f32 %v1168_v7, %v1167_v5  ;;  %v1170_v15 = vpop.f32.mrb[26].mxu0  ;;  %950 = vst.msk [vmem:[%s1642_s3 + $0x4] sm:$0xf] %vm948_vm1, %v1052_v6  ;;  %v1196_v59 = vpop.f32.mrb[26].mxu1 }
 0x12a   :  { %v1171_v16 = vpop.f32.mrb[27].mxu0  ;;  %v914_v18 = vmax.f32 %v902_v11, 0.0  ;;  %v905_v20 = vadd.f32 %v1196_v59, %v840_v48  ;;  %v896_v21 = vpop.f32.mrb[27].mxu1 }
 0x12b   :  { %951 = vst.msk [vmem:[%s1642_s3 + $0x8] sm:$0xf] %vm948_vm1, %v1053_v8  ;;  %v1054_v17 = vpack.c.bf16 %v911_v9, %v911_v9  ;;  %v829_v19 = vadd.f32 %v1169_v12, %v1597_v10  ;;  %v1172_v22 = vadd.f32 %v1171_v16, %v1170_v15 }
 0x12c   :  { %v1057_v23 = vpack.c.bf16 %v914_v18, %v914_v18  ;;  %v915_v25 = vmax.f32 %v905_v20, 0.0 }
 0x12d   :  { %952 = vst.msk [vmem:[%s1642_s3 + $0xc] sm:$0xf] %vm948_vm1, %v1054_v17  ;;  %v894_v24 = vadd.f32 %v893_v14, %v829_v19  ;;  %v832_v26 = vadd.f32 %v1172_v22, %v1599_v13 }
 0x12e   :  { %955 = vst.msk [vmem:[%s1642_s3 + $0x18] sm:$0xf] %vm948_vm1, %v1057_v23  ;;  %v1058_v10 = vpack.c.bf16 %v915_v25, %v915_v25 }
 0x12f   :  { %v912_v27 = vmax.f32 %v894_v24, 0.0  ;;  %v897_v28 = vadd.f32 %v896_v21, %v832_v26 }
 0x130   :  { %956 = vst.msk [vmem:[%s1642_s3 + $0x1c] sm:$0xf] %vm948_vm1, %v1058_v10 }
 0x131   :  { %v1055_v29 = vpack.c.bf16 %v912_v27, %v912_v27  ;;  %v913_v30 = vmax.f32 %v897_v28, 0.0 }
 0x133   :  { %953 = vst.msk [vmem:[%s1642_s3 + $0x10] sm:$0xf] %vm948_vm1, %v1055_v29  ;;  %v1056_v13 = vpack.c.bf16 %v913_v30, %v913_v30 }
 0x135   :  { %954 = vst.msk [vmem:[%s1642_s3 + $0x14] sm:$0xf] %vm948_vm1, %v1056_v13 }

// kernel: feature_net_forward.23
= control target key start
LH: loop header
LB: loop body
LE: loop exit
PB: predicated region body
PF: predicated region fallthrough
CT: control target
= control target key end

     0   :  { %v1079_v1 = vmov 0   ;;  %vm237_vm0 = vcmask 261120   ;;  %vm327_vm1 = vcmask 1043456   ;;  %vm183_vm2 = vcmask 64512   ;;  %s1357_s1 = inlined_call_operand.vmem [shape: bf16[32,32], index: 1, kind: input, shape index: {}]   ;;  %s1358_s4 = inlined_call_operand.vmem [shape: bf16[64,32], index: 4, kind: input, shape index: {}]   ;;  %s1359_s7 = inlined_call_operand.vmem [shape: bf16[8,32], index: 7, kind: input, shape index: {}]   ;;  %s1360_s0 = inlined_call_operand.vmem [shape: bf16[64,8], index: 0, kind: input, shape index: {}]   ;;  %s1361_s5 = inlined_call_operand.vmem [shape: f32[64,1], index: 5, kind: input, shape index: {}]   ;;  %s1362_s3 = inlined_call_operand.vmem [shape: bf16[64,64], index: 3, kind: input, shape index: {}]   ;;  %s1363_s2 = inlined_call_operand.vmem [shape: bf16[16,128], index: 2, kind: input, shape index: {}]   ;;  %s1364_s9 = inlined_call_operand.vmem [shape: f32[64,1], index: 9, kind: input, shape index: {}]   ;;  %s1365_s8 = inlined_call_operand.vmem [shape: bf16[64,16], index: 8, kind: input, shape index: {}]   ;;  %s1366_s11 = inlined_call_operand.vmem [shape: bf16[32,128], index: 11, kind: input, shape index: {}]   ;;  %s1367_s12 = inlined_call_operand.vmem [shape: f32[64,8], index: 12, kind: output, shape index: {0}]   ;;  %s1368_s6 = inlined_call_operand.vmem [shape: bf16[32,64], index: 6, kind: input, shape index: {}]   ;;  %s1369_s10 = inlined_call_operand.vmem [shape: bf16[16,64], index: 10, kind: input, shape index: {}]   ;;  %s1370_s13 = inlined_call_operand.vmem [shape: f32[32,32], index: 13, kind: output, shape index: {1}]   ;;  %s1371_s14 = inlined_call_operand.vmem [shape: f32[16,128], index: 14, kind: output, shape index: {2}]  }
   0x1   :  { %v1055_v0 = vld [vmem:[%s1357_s1] sm:$0xff]   ;;  %1053 = vset.pattern.permute.xlu0 %v1079_v1  ;;  %1054 = vset.pattern.permute.xlu1 %v1079_v1  ;;  %v1056_v2 = vld [vmem:[%s1357_s1 + $0x8] sm:$0xff]   ;;  %v1059_v6 = vld [vmem:[%s1358_s4 + $0x10] sm:$0xff]   ;;  %vm105_vm3 = vcmask 523264   ;;  %vm569_vm4 = vcmask 130048   ;;  %vm1081_vm5 = vmmov 0  }
   0x2   :  { %965 = vmatprep.subr.bf16.mxu1 %v1055_v0  ;;  %v1057_v3 = vld [vmem:[%s1358_s4] sm:$0xff]   ;;  %v1058_v4 = vld [vmem:[%s1358_s4 + $0x8] sm:$0xff]   ;;  %v398_v10 = vld [vmem:[%s1361_s5 + $0x10] sm:$0xff] }
   0x3   :  { %966 = vmatpush3.bf16.msra.mxu1 %v1055_v0  ;;  %969 = vmatprep.mubr.msk.bf16.mxu1 %vm237_vm0, %v1057_v3  ;;  %v192_v5 = vld [vmem:[%s1359_s7] sm:$0xf]  ;;  %v1062_v11 = vld [vmem:[%s1360_s0 + $0x8] sm:$0xff]   ;;  %v1063_v12 = vld [vmem:[%s1360_s0 + $0x10] sm:$0xff]  }
   0x4   :  { %967 = vmatprep.subr.bf16.mxu1 %v1056_v2  ;;  %v1061_v7 = vld [vmem:[%s1360_s0] sm:$0xff]   ;;  %v329_v8 = vsel %vm327_vm1, %v192_v5, 0  ;;  %416 = vperm.xlu1 %1054, %v398_v10   ;;  %v397_v13 = vld [vmem:[%s1361_s5 + $0x8] sm:$0xff]  ;;  %v399_v14 = vld [vmem:[%s1361_s5 + $0x18] sm:$0xff] }
   0x5   :  { %949 = vmatprep.subr.bf16.mxu0 %v1061_v7  ;;  %v396_v9 = vld [vmem:[%s1361_s5] sm:$0xff]  ;;  %v1060_v15 = vld [vmem:[%s1358_s4 + $0x18] sm:$0xff]   ;;  %v401_v18 = vld [vmem:[%s1361_s5 + $0x28] sm:$0xff] }
   0x6   :  { %950 = vmatpush3.bf16.msra.mxu0 %v1061_v7  ;;  %406 = vperm.xlu0 %1053, %v396_v9   ;;  %v1064_v16 = vld [vmem:[%s1360_s0 + $0x18] sm:$0xff]   ;;  %v400_v17 = vld [vmem:[%s1361_s5 + $0x20] sm:$0xff]  ;;  %v402_v21 = vld [vmem:[%s1361_s5 + $0x30] sm:$0xff] }
   0x7   :  { %968 = vmatpush3.bf16.msra.mxu1 %v1056_v2  ;;  %951 = vmatprep.subr.bf16.mxu0 %v1062_v11  ;;  %v1065_v19 = vld [vmem:[%s1362_s3] sm:$0xff]   ;;  %v403_v22 = vld [vmem:[%s1361_s5 + $0x38] sm:$0xff]  ;;  %v1066_v23 = vld [vmem:[%s1362_s3 + $0x8] sm:$0xff]  }
   0x8   :  { %1049 = vmatprep.subr.msk.bf16.mxu1 %vm327_vm1, %v192_v5  ;;  %421 = vperm.xlu1 %1054, %v399_v14   ;;  %v1067_v20 = vld [vmem:[%s1363_s2] sm:$0xff]   ;;  %v1068_v24 = vld [vmem:[%s1362_s3 + $0x10] sm:$0xff]   ;;  %v737_v26 = vld [vmem:[%s1364_s9 + $0x8] sm:$0xff]  ;;  %v1080_v14 = vmov 0.0  }
   0x9   :  { %957 = vmatprep.mubr.msk.bf16.mxu0 %vm105_vm3, %v1065_v19  ;;  %v736_v25 = vld [vmem:[%s1364_s9] sm:$0xff]  ;;  %v738_v27 = vld [vmem:[%s1364_s9 + $0x10] sm:$0xff]  ;;  %v739_v28 = vld [vmem:[%s1364_s9 + $0x18] sm:$0xff] }
   0xa   :  { %970 = vmatmul.mubr.msk.bf16.vlgmr.msra.gmra.mrb[0].mxu1 %vm237_vm0, %v1058_v4  ;;  %952 = vmatpush3.bf16.msra.mxu0 %v1062_v11  ;;  %v1069_v29 = vld [vmem:[%s1362_s3 + $0x18] sm:$0xff]   ;;  %v740_v30 = vld [vmem:[%s1364_s9 + $0x20] sm:$0xff]  ;;  %v741_v32 = vld [vmem:[%s1364_s9 + $0x28] sm:$0xff] }
   0xb   :  { %978 = vmatpush3.bf16.msra.mxu1 %v329_v8  ;;  %973 = vmatprep.mubr.msk.bf16.mxu1 %vm237_vm0, %v1059_v6  ;;  %v1070_v31 = vld [vmem:[%s1365_s8] sm:$0xff]   ;;  %v742_v34 = vld [vmem:[%s1364_s9 + $0x30] sm:$0xff]  ;;  %v743_v35 = vld [vmem:[%s1364_s9 + $0x38] sm:$0xff] }
   0xc   :  { %953 = vmatprep.subr.bf16.mxu0 %v1063_v12  ;;  %411 = vperm.xlu0 %1053, %v397_v13   ;;  %v1072_v33 = vld [vmem:[%s1366_s11] sm:$0xff]   ;;  %v1071_v36 = vld [vmem:[%s1365_s8 + $0x8] sm:$0xff]   ;;  %v1073_v37 = vld [vmem:[%s1365_s8 + $0x10] sm:$0xff]  }
   0xd   :  { %431 = vperm.xlu1 %1054, %v401_v18   ;;  %v1074_v38 = vld [vmem:[%s1365_s8 + $0x18] sm:$0xff]   ;;  %v1075_v39 = vld [vmem:[%s1366_s11 + $0x8] sm:$0xff]  }
   0xe   :  { %954 = vmatpush3.bf16.msra.mxu0 %v1063_v12  ;;  %v1077_v13 = vld [vmem:[%s1368_s6 + $0x8] sm:$0xff]  }
   0xf   :  { %955 = vmatprep.subr.bf16.mxu0 %v1064_v16 }
  0x10   :  { %426 = vperm.xlu0 %1053, %v400_v17  }
  0x11   :  { %441 = vperm.xlu1 %1054, %v403_v22  }
  0x12   :  { %974 = vmatmul.mubr.msk.bf16.gmra.mrb[4].mxu1 %vm237_vm0, %v1060_v15  ;;  %956 = vmatpush3.bf16.msra.mxu0 %v1064_v16 }
  0x13   :  { %979 = vmatprep.mubr.msk.bf16.mxu1 %vm183_vm2, %v1061_v7  ;;  %999 = vmatprep.subr.bf16.mxu0 %v1067_v20 }
  0x14   :  { %436 = vperm.xlu0 %1053, %v402_v21  }
  0x15   :  { %958 = vmatmul.mubr.msk.bf16.vlgmr.msra.gmra.mrb[0].mxu0 %vm105_vm3, %v1066_v23  ;;  %751 = vperm.xlu1 %1054, %v737_v26  }
  0x16   :  { %1000 = vmatpush3.bf16.msra.mxu0 %v1067_v20  ;;  %961 = vmatprep.mubr.msk.bf16.mxu0 %vm105_vm3, %v1068_v24 }
  0x17   :  { %1009 = vmatprep.subr.bf16.mxu0 %v1072_v33 }
  0x18   :  { %746 = vperm.xlu0 %1053, %v736_v25  }
  0x19   :  { %761 = vperm.xlu1 %1054, %v739_v28  }
  0x1a   :  { %980 = vmatmul.mubr.msk.bf16.vlgmr.msra.gmra.mrb[0].mxu1 %vm183_vm2, %v1062_v11 }
  0x1b   :  { %983 = vmatprep.mubr.msk.bf16.mxu1 %vm183_vm2, %v1063_v12  ;;  %v1076_v12 = vld [vmem:[%s1368_s6] sm:$0xff]  }
  0x1c   :  { %756 = vperm.xlu0 %1053, %v738_v27  }
  0x1d   :  { %962 = vmatmul.mubr.msk.bf16.gmra.mrb[4].mxu0 %vm105_vm3, %v1069_v29  ;;  %771 = vperm.xlu1 %1054, %v741_v32  }
  0x1e   :  { %1001 = vmatprep.mubr.msk.bf16.mxu0 %vm569_vm4, %v1070_v31 }
  0x20   :  { %766 = vperm.xlu0 %1053, %v740_v30  }
  0x21   :  { %781 = vperm.xlu1 %1054, %v743_v35  }
  0x22   :  { %984 = vmatmul.mubr.msk.bf16.gmra.mrb[4].mxu1 %vm183_vm2, %v1064_v16 }
  0x23   :  { %995 = vmatprep.mubr.msk.bf16.mxu1 %vm105_vm3, %v1076_v12 }
  0x24   :  { %776 = vperm.xlu0 %1053, %v742_v34  }
  0x25   :  { %1002 = vmatmul.mubr.msk.bf16.vlgmr.msra.gmra.mrb[8].mxu0 %vm569_vm4, %v1071_v36 }
  0x26   :  { %1010 = vmatpush3.bf16.msra.mxu0 %v1072_v33  ;;  %1005 = vmatprep.mubr.msk.bf16.mxu0 %vm569_vm4, %v1073_v37 }
  0x27   :  { %1011 = vmatprep.subr.bf16.mxu0 %v1075_v39 }
  0x2a   :  { %1012 = vmatpush3.bf16.msra.mxu0 %v1075_v39 }
  0x2d   :  { %1006 = vmatmul.mubr.msk.bf16.gmra.mrb[12].mxu0 %vm569_vm4, %v1074_v38 }
  0x83   :  { %v417_v41 = vpop.permute.xlu1 %416 }
  0x85   :  { %v407_v40 = vpop.permute.xlu0 %406 }
  0x87   :  { %v422_v43 = vpop.permute.xlu1 %421 }
  0x8b   :  { %v412_v42 = vpop.permute.xlu0 %411 }
  0x8c   :  { %v432_v45 = vpop.permute.xlu1 %431 }
  0x8f   :  { %v427_v44 = vpop.permute.xlu0 %426 }
  0x90   :  { %v442_v61 = vpop.permute.xlu1 %441 }
  0x93   :  { %v437_v59 = vpop.permute.xlu0 %436 }
  0x94   :  { %v752_v16 = vpop.permute.xlu1 %751 }
  0x97   :  { %v747_v15 = vpop.permute.xlu0 %746 }
  0x98   :  { %v762_v18 = vpop.permute.xlu1 %761 }
  0x9b   :  { %v757_v17 = vpop.permute.xlu0 %756 }
  0x9c   :  { %v772_v26 = vpop.permute.xlu1 %771 }
  0x9f   :  { %v767_v22 = vpop.permute.xlu0 %766 }
  0xa0   :  { %v782_v34 = vpop.permute.xlu1 %781 }
  0xa3   :  { %v777_v32 = vpop.permute.xlu0 %776 }
  0xe8   :  { %v959_v46 = vpop.f32.mrb[0].mxu0 }
  0xe9   :  { %186 = vst.msk [vmem:[%s1367_s12 + $0x10] sm:$0xff] %vm183_vm2, %v959_v46  ;;  %v152_v48 = vpop.f32.mrb[1].mxu0 }
  0xea   :  { %184 = vst.msk [vmem:[%s1367_s12] sm:$0xff] %vm183_vm2, %v152_v48  ;;  %v960_v50 = vpop.f32.mrb[2].mxu0 }
  0xeb   :  { %187 = vst.msk [vmem:[%s1367_s12 + $0x18] sm:$0xff] %vm183_vm2, %v960_v50  ;;  %v155_v52 = vpop.f32.mrb[3].mxu0 }
  0xec   :  { %185 = vst.msk [vmem:[%s1367_s12 + $0x8] sm:$0xff] %vm183_vm2, %v155_v52 }
  0xed   :  { %v981_v47 = vpop.f32.mrb[0].mxu1 }
  0xee   :  { %v365_v49 = vpop.f32.mrb[1].mxu1  ;;  %v446_v53 = vadd.f32 %v981_v47, %v417_v41 }
  0xef   :  { %v982_v51 = vpop.f32.mrb[2].mxu1  ;;  %v444_v56 = vadd.f32 %v407_v40, %v365_v49 }
  0xf0   :  { %v447_v54 = vadd.f32 %v982_v51, %v422_v43  ;;  %v368_v55 = vpop.f32.mrb[3].mxu1  ;;  %v963_v62 = vpop.f32.mrb[4].mxu0  ;;  %v1078_v43 = vld [vmem:[%s1369_s10] sm:$0xff]  }
  0xf1   :  { %v445_v57 = vadd.f32 %v412_v42, %v368_v55  ;;  %190 = vst.msk [vmem:[%s1367_s12 + $0x30] sm:$0xff] %vm183_vm2, %v963_v62  ;;  %v168_v0 = vpop.f32.mrb[5].mxu0 }
  0xf2   :  { %v453_v58 = vpack.c.bf16 %v447_v54, %v446_v53  ;;  %188 = vst.msk [vmem:[%s1367_s12 + $0x20] sm:$0xff] %vm183_vm2, %v168_v0  ;;  %v964_v2 = vpop.f32.mrb[6].mxu0 }
  0xf3   :  { %v452_v60 = vpack.c.bf16 %v445_v57, %v444_v56  ;;  %191 = vst.msk [vmem:[%s1367_s12 + $0x38] sm:$0xff] %vm183_vm2, %v964_v2  ;;  %v171_v4 = vpop.f32.mrb[7].mxu0 }
  0xf4   :  { %189 = vst.msk [vmem:[%s1367_s12 + $0x28] sm:$0xff] %vm183_vm2, %v171_v4 }
  0xf5   :  { %v985_v63 = vpop.f32.mrb[4].mxu1  ;;  %987 = vmatprep.subr.bf16.mxu1 %v452_v60  ;;  %1013 = vmatprep.mubr.msk.bf16.mxu0 %vm237_vm0, %v452_v60 }
  0xf6   :  { %v381_v1 = vpop.f32.mrb[5].mxu1  ;;  %988 = vmatpush3.bf16.msra.mxu1 %v452_v60  ;;  %1014 = vmatmul.mubr.msk.bf16.vlgmr.msra.gmra.mrb[8].mxu0 %vm237_vm0, %v453_v58  ;;  %v450_v5 = vadd.f32 %v985_v63, %v437_v59 }
  0xf7   :  { %v986_v3 = vpop.f32.mrb[6].mxu1  ;;  %989 = vmatprep.subr.bf16.mxu1 %v453_v58  ;;  %v448_v8 = vadd.f32 %v427_v44, %v381_v1 }
  0xf8   :  { %v451_v6 = vadd.f32 %v986_v3, %v442_v61  ;;  %v384_v7 = vpop.f32.mrb[7].mxu1 }
  0xf9   :  { %v449_v9 = vadd.f32 %v432_v45, %v384_v7 }
  0xfa   :  { %v455_v10 = vpack.c.bf16 %v451_v6, %v450_v5  ;;  %990 = vmatpush3.bf16.msra.mxu1 %v453_v58 }
  0xfb   :  { %v454_v11 = vpack.c.bf16 %v449_v9, %v448_v8 }
  0xfd   :  { %991 = vmatprep.subr.bf16.mxu1 %v454_v11  ;;  %1017 = vmatprep.mubr.msk.bf16.mxu0 %vm237_vm0, %v454_v11 }
  0xfe   :  { %992 = vmatpush3.bf16.msra.mxu1 %v454_v11  ;;  %1018 = vmatmul.mubr.msk.bf16.gmra.mrb[12].mxu0 %vm237_vm0, %v455_v10 }
  0xff   :  { %993 = vmatprep.subr.bf16.mxu1 %v455_v10 }
 0x102   :  { %994 = vmatpush3.bf16.msra.mxu1 %v455_v10 }
 0x103   :  { %1021 = vmatprep.subr.bf16.mxu1 %v1080_v14 }
 0x105   :  { %996 = vmatmul.mubr.msk.bf16.vlgmr.msra.gmra.mrb[8].mxu1 %vm105_vm3, %v1077_v13 }
 0x106   :  { %1029 = vmatprep.mubr.msk.bf16.mxu1 %vm1081_vm5, %v1080_v14 }
 0x1c9   :  { %v1015_v19 = vpop.f32.mrb[8].mxu0 }
 0x1ca   :  { %v705_v20 = vpop.f32.mrb[9].mxu0  ;;  %v786_v23 = vadd.f32 %v1015_v19, %v757_v17 }
 0x1cb   :  { %v1016_v21 = vpop.f32.mrb[10].mxu0  ;;  %v784_v27 = vadd.f32 %v747_v15, %v705_v20 }
 0x1cc   :  { %v787_v24 = vadd.f32 %v1016_v21, %v762_v18  ;;  %v708_v25 = vpop.f32.mrb[11].mxu0 }
 0x1cd   :  { %v785_v28 = vadd.f32 %v752_v16, %v708_v25 }
 0x1ce   :  { %v793_v29 = vpack.c.bf16 %v787_v24, %v786_v23 }
 0x1cf   :  { %v792_v30 = vpack.c.bf16 %v785_v28, %v784_v27 }
 0x1d1   :  { %v1019_v31 = vpop.f32.mrb[12].mxu0  ;;  %1022 = vmatpush3.bf16.msra.mxu1 %v792_v30 }
 0x1d2   :  { %v721_v33 = vpop.f32.mrb[13].mxu0  ;;  %1023 = vmatprep.subr.bf16.mxu1 %v1080_v14  ;;  %v790_v36 = vadd.f32 %v1019_v31, %v777_v32 }
 0x1d3   :  { %v1020_v35 = vpop.f32.mrb[14].mxu0  ;;  %v788_v39 = vadd.f32 %v767_v22, %v721_v33 }
 0x1d4   :  { %v791_v37 = vadd.f32 %v1020_v35, %v782_v34  ;;  %v724_v38 = vpop.f32.mrb[15].mxu0 }
 0x1d5   :  { %v789_v40 = vadd.f32 %v772_v26, %v724_v38  ;;  %1024 = vmatpush3.bf16.msra.mxu1 %v793_v29 }
 0x1d6   :  { %v795_v41 = vpack.c.bf16 %v791_v37, %v790_v36  ;;  %1025 = vmatprep.subr.bf16.mxu1 %v1080_v14 }
 0x1d7   :  { %v794_v42 = vpack.c.bf16 %v789_v40, %v788_v39 }
 0x1d8   :  { %v997_v44 = vpop.f32.mrb[8].mxu1 }
 0x1d9   :  { %1026 = vmatpush3.bf16.msra.mxu1 %v794_v42  ;;  %527 = vst.msk [vmem:[%s1370_s13 + $0x10] sm:$0xff] %vm237_vm0, %v997_v44  ;;  %v510_v45 = vpop.f32.mrb[9].mxu1 }
 0x1da   :  { %1027 = vmatprep.subr.bf16.mxu1 %v1080_v14  ;;  %525 = vst.msk [vmem:[%s1370_s13] sm:$0xff] %vm237_vm0, %v510_v45  ;;  %v998_v46 = vpop.f32.mrb[10].mxu1 }
 0x1db   :  { %528 = vst.msk [vmem:[%s1370_s13 + $0x18] sm:$0xff] %vm237_vm0, %v998_v46  ;;  %v513_v47 = vpop.f32.mrb[11].mxu1 }
 0x1dc   :  { %526 = vst.msk [vmem:[%s1370_s13 + $0x8] sm:$0xff] %vm237_vm0, %v513_v47 }
 0x1dd   :  { %1028 = vmatpush3.bf16.msra.mxu1 %v795_v41 }
 0x1e0   :  { %1030 = vmatmul.mubr.msk.bf16.vlgmr.msra.gmra.mrb[12].mxu1 %vm105_vm3, %v1078_v43 }
 0x2b3   :  { %v840_v48 = vpop.f32.mrb[12].mxu1 }
 0x2b4   :  { %847 = vst [vmem:[%s1371_s14] sm:$0xff] %v840_v48  ;;  %v1031_v49 = vpop.f32.mrb[13].mxu1 }
 0x2b5   :  { %v843_v50 = vpop.f32.mrb[14].mxu1 }
 0x2b6   :  { %848 = vst [vmem:[%s1371_s14 + $0x8] sm:$0xff] %v843_v50  ;;  %v1032_v51 = vpop.f32.mrb[15].mxu1 }

// kernel: feature_net_forward.21
= control target key start
LH: loop header
LB: loop body
LE: loop exit
PB: predicated region body
PF: predicated region fallthrough
CT: control target
= control target key end

     0   :  { %v991_v1 = vmov 0   ;;  %vm475_vm0 = vcmask 523264   ;;  %vm723_vm1 = vcmask 60416   ;;  %s1243_s1 = inlined_call_operand.vmem [shape: bf16[576,8], index: 1, kind: input, shape index: {}]   ;;  %s1244_s0 = inlined_call_operand.vmem [shape: bf16[64,576], index: 0, kind: input, shape index: {}]   ;;  %s1245_s2 = inlined_call_operand.vmem [shape: f32[64,1], index: 2, kind: input, shape index: {}]   ;;  %s1246_s3 = inlined_call_operand.vmem [shape: bf16[64,8], index: 3, kind: output, shape index: {}]  }
   0x1   :  { %v927_v0 = vld [vmem:[%s1243_s1 + $0x40] sm:$0xff]   ;;  %925 = vset.pattern.permute.xlu0 %v991_v1  ;;  %926 = vset.pattern.permute.xlu1 %v991_v1  ;;  %v931_v5 = vld [vmem:[%s1243_s1 + $0x48] sm:$0xff]   ;;  %v935_v9 = vld [vmem:[%s1243_s1 + $0x50] sm:$0xff]  }
   0x2   :  { %v928_v2 = vld [vmem:[%s1243_s1 + $0xc0] sm:$0xff]   ;;  %812 = vmatprep.subr.bf16.mxu0 %v927_v0  ;;  %v932_v6 = vld [vmem:[%s1243_s1 + $0xc8] sm:$0xff]   ;;  %v936_v10 = vld [vmem:[%s1243_s1 + $0xd0] sm:$0xff]  }
   0x3   :  { %v929_v3 = vld [vmem:[%s1243_s1] sm:$0xff]   ;;  %852 = vmatprep.subr.bf16.mxu1 %v928_v2  ;;  %v933_v7 = vld [vmem:[%s1243_s1 + $0x8] sm:$0xff]   ;;  %v937_v11 = vld [vmem:[%s1243_s1 + $0x10] sm:$0xff]  }
   0x4   :  { %v930_v4 = vld [vmem:[%s1243_s1 + $0x80] sm:$0xff]   ;;  %813 = vmatpush3.bf16.msra.mxu0 %v929_v3  ;;  %v934_v8 = vld [vmem:[%s1243_s1 + $0x88] sm:$0xff]   ;;  %v938_v12 = vld [vmem:[%s1243_s1 + $0x90] sm:$0xff]  }
   0x5   :  { %853 = vmatpush3.bf16.msra.mxu1 %v930_v4  ;;  %814 = vmatprep.subr.bf16.mxu0 %v931_v5  ;;  %v939_v13 = vld [vmem:[%s1243_s1 + $0x58] sm:$0xff]   ;;  %v943_v17 = vld [vmem:[%s1243_s1 + $0x60] sm:$0xff]   ;;  %v947_v21 = vld [vmem:[%s1243_s1 + $0x68] sm:$0xff]  }
   0x6   :  { %854 = vmatprep.subr.bf16.mxu1 %v932_v6  ;;  %v940_v14 = vld [vmem:[%s1243_s1 + $0xd8] sm:$0xff]   ;;  %v944_v18 = vld [vmem:[%s1243_s1 + $0xe0] sm:$0xff]   ;;  %v948_v22 = vld [vmem:[%s1243_s1 + $0xe8] sm:$0xff]  }
   0x7   :  { %v941_v15 = vld [vmem:[%s1243_s1 + $0x18] sm:$0xff]   ;;  %v945_v19 = vld [vmem:[%s1243_s1 + $0x20] sm:$0xff]   ;;  %v949_v23 = vld [vmem:[%s1243_s1 + $0x28] sm:$0xff]  }
   0x8   :  { %815 = vmatpush3.bf16.msra.mxu0 %v933_v7  ;;  %v942_v16 = vld [vmem:[%s1243_s1 + $0x98] sm:$0xff]   ;;  %v946_v20 = vld [vmem:[%s1243_s1 + $0xa0] sm:$0xff]   ;;  %v950_v24 = vld [vmem:[%s1243_s1 + $0xa8] sm:$0xff]  }
   0x9   :  { %855 = vmatpush3.bf16.msra.mxu1 %v934_v8  ;;  %816 = vmatprep.subr.bf16.mxu0 %v935_v9  ;;  %v951_v25 = vld [vmem:[%s1243_s1 + $0x70] sm:$0xff]   ;;  %v955_v29 = vld [vmem:[%s1243_s1 + $0x78] sm:$0xff]   ;;  %v964_v36 = vld [vmem:[%s1244_s0 + $0xc] ss:$20 sps:$4 sm:$0xff]  }
   0xa   :  { %856 = vmatprep.subr.bf16.mxu1 %v936_v10  ;;  %v952_v26 = vld [vmem:[%s1243_s1 + $0xf0] sm:$0xff]   ;;  %v956_v30 = vld [vmem:[%s1243_s1 + $0xf8] sm:$0xff]   ;;  %v965_v37 = vld [vmem:[%s1243_s1 + $0x100] sm:$0xff]   ;;  %585 = vmatprep.mubr.bf16.mxu1 %v964_v36 }
   0xb   :  { %v953_v27 = vld [vmem:[%s1243_s1 + $0x30] sm:$0xff]   ;;  %v957_v31 = vld [vmem:[%s1243_s1 + $0x38] sm:$0xff]   ;;  %v966_v38 = vld [vmem:[%s1244_s0 + $0x2c] ss:$20 sps:$4 sm:$0xff]  }
   0xc   :  { %817 = vmatpush3.bf16.msra.mxu0 %v937_v11  ;;  %v954_v28 = vld [vmem:[%s1243_s1 + $0xb0] sm:$0xff]   ;;  %v958_v32 = vld [vmem:[%s1243_s1 + $0xb8] sm:$0xff]   ;;  %v972_v40 = vld [vmem:[%s1243_s1 + $0x108] sm:$0xff]  }
   0xd   :  { %857 = vmatpush3.bf16.msra.mxu1 %v938_v12  ;;  %818 = vmatprep.subr.bf16.mxu0 %v939_v13  ;;  %v959_v33 = vld [vmem:[%s1244_s0] ss:$20 sps:$4 sm:$0xff]   ;;  %v961_v34 = vld [vmem:[%s1244_s0 + $0x4] ss:$20 sps:$4 sm:$0xff]   ;;  %v962_v35 = vld [vmem:[%s1244_s0 + $0x8] ss:$20 sps:$4 sm:$0xff]  }
   0xe   :  { %858 = vmatprep.subr.bf16.mxu1 %v940_v14  ;;  %520 = vmatprep.mubr.bf16.mxu0 %v961_v34  ;;  %v968_v39 = vld [vmem:[%s1244_s0 + $0x34] ss:$20 sps:$4 sm:$0xff]   ;;  %v971_v42 = vld [vmem:[%s1244_s0 + $0x30] ss:$20 sps:$4 sm:$0xff]   ;;  %v986_v46 = vld [vmem:[%s1243_s1 + $0x118] sm:$0xff]  }
   0xf   :  { %v970_v41 = vld [vmem:[%s1244_s0 + $0x28] ss:$20 sps:$4 sm:$0xff]   ;;  %v979_v45 = vld [vmem:[%s1243_s1 + $0x110] sm:$0xff]   ;;  %v978_v48 = vld [vmem:[%s1244_s0 + $0x58] ss:$20 sps:$4 sm:$0xff]  }
  0x10   :  { %819 = vmatpush3.bf16.msra.mxu0 %v941_v15  ;;  %v973_v43 = vld [vmem:[%s1244_s0 + $0x54] ss:$20 sps:$4 sm:$0xff]   ;;  %v975_v44 = vld [vmem:[%s1244_s0 + $0x5c] ss:$20 sps:$4 sm:$0xff]   ;;  %v982_v50 = vld [vmem:[%s1244_s0 + $0x84] ss:$20 sps:$4 sm:$0xff]  }
  0x11   :  { %859 = vmatpush3.bf16.msra.mxu1 %v942_v16  ;;  %820 = vmatprep.subr.bf16.mxu0 %v943_v17  ;;  %v977_v47 = vld [vmem:[%s1244_s0 + $0x50] ss:$20 sps:$4 sm:$0xff]   ;;  %v112_v53 = vld [vmem:[%s1245_s2 + $0x8] sm:$0xff]  ;;  %v114_v54 = vld [vmem:[%s1245_s2 + $0x18] sm:$0xff] }
  0x12   :  { %860 = vmatprep.subr.bf16.mxu1 %v944_v18  ;;  %v980_v49 = vld [vmem:[%s1244_s0 + $0x7c] ss:$20 sps:$4 sm:$0xff]   ;;  %v111_v51 = vld [vmem:[%s1245_s2] sm:$0xff]  ;;  %v984_v55 = vld [vmem:[%s1244_s0 + $0x78] ss:$20 sps:$4 sm:$0xff]  }
  0x13   :  { %v113_v52 = vld [vmem:[%s1245_s2 + $0x10] sm:$0xff]  ;;  %121 = vperm.xlu0 %925, %v111_v51   ;;  %v115_v58 = vld [vmem:[%s1245_s2 + $0x20] sm:$0xff]  ;;  %v116_v60 = vld [vmem:[%s1245_s2 + $0x28] sm:$0xff] }
  0x14   :  { %821 = vmatpush3.bf16.msra.mxu0 %v945_v19  ;;  %131 = vperm.xlu1 %926, %v113_v52   ;;  %v985_v56 = vld [vmem:[%s1244_s0 + $0x80] ss:$20 sps:$4 sm:$0xff]   ;;  %v987_v57 = vld [vmem:[%s1244_s0 + $0x10] ss:$20 sps:$4 sm:$0xff]   ;;  %v118_v62 = vld [vmem:[%s1245_s2 + $0x38] sm:$0xff] }
  0x15   :  { %861 = vmatpush3.bf16.msra.mxu1 %v946_v20  ;;  %822 = vmatprep.subr.bf16.mxu0 %v947_v21  ;;  %v988_v59 = vld [vmem:[%s1244_s0 + $0x60] ss:$20 sps:$4 sm:$0xff]   ;;  %v989_v63 = vld [vmem:[%s1244_s0 + $0x38] ss:$20 sps:$4 sm:$0xff]   ;;  %v990_v0 = vld [vmem:[%s1244_s0 + $0x88] ss:$20 sps:$4 sm:$0xff]  }
  0x16   :  { %862 = vmatprep.subr.bf16.mxu1 %v948_v22  ;;  %v117_v61 = vld [vmem:[%s1245_s2 + $0x30] sm:$0xff] }
  0x17   :  { %126 = vperm.xlu0 %925, %v112_v53  }
  0x18   :  { %823 = vmatpush3.bf16.msra.mxu0 %v949_v23  ;;  %136 = vperm.xlu1 %926, %v114_v54  }
  0x19   :  { %863 = vmatpush3.bf16.msra.mxu1 %v950_v24  ;;  %824 = vmatprep.subr.bf16.mxu0 %v951_v25 }
  0x1a   :  { %864 = vmatprep.subr.bf16.mxu1 %v952_v26 }
  0x1b   :  { %141 = vperm.xlu0 %925, %v115_v58  }
  0x1c   :  { %825 = vmatpush3.bf16.msra.mxu0 %v953_v27  ;;  %146 = vperm.xlu1 %926, %v116_v60  }
  0x1d   :  { %865 = vmatpush3.bf16.msra.mxu1 %v954_v28  ;;  %826 = vmatprep.subr.bf16.mxu0 %v955_v29 }
  0x1e   :  { %866 = vmatprep.subr.bf16.mxu1 %v956_v30 }
  0x1f   :  { %151 = vperm.xlu0 %925, %v117_v61  }
  0x20   :  { %827 = vmatpush3.bf16.msra.mxu0 %v957_v31  ;;  %156 = vperm.xlu1 %926, %v118_v62  }
  0x21   :  { %867 = vmatpush3.bf16.msra.mxu1 %v958_v32  ;;  %900 = vmatprep.subr.bf16.mxu0 %v965_v37 }
  0x22   :  { %916 = vmatprep.subr.bf16.mxu1 %v965_v37 }
  0x23   :  { %521 = vmatmul.mubr.bf16.vlgmr.msra.gmra.mrb[0].mxu0 %v959_v33 }
  0x24   :  { %586 = vmatmul.mubr.bf16.vlgmr.msra.gmra.mrb[0].mxu1 %v962_v35  ;;  %901 = vmatpush3.bf16.msra.mxu0 %v965_v37 }
  0x25   :  { %920 = vmatpush3.bf16.msra.mxu1 %v965_v37  ;;  %528 = vmatprep.mubr.bf16.mxu0 %v966_v38 }
  0x26   :  { %593 = vmatprep.mubr.bf16.mxu1 %v968_v39  ;;  %902 = vmatprep.subr.bf16.mxu0 %v972_v40 }
  0x27   :  { %917 = vmatprep.subr.bf16.mxu1 %v972_v40 }
  0x28   :  { %903 = vmatpush3.bf16.msra.mxu0 %v972_v40 }
  0x29   :  { %921 = vmatpush3.bf16.msra.mxu1 %v972_v40  ;;  %904 = vmatprep.subr.bf16.mxu0 %v979_v45 }
  0x2a   :  { %918 = vmatprep.subr.bf16.mxu1 %v979_v45 }
  0x2b   :  { %529 = vmatmul.mubr.bf16.gmra.mrb[4].mxu0 %v970_v41 }
  0x2c   :  { %594 = vmatmul.mubr.bf16.gmra.mrb[4].mxu1 %v971_v42  ;;  %536 = vmatprep.mubr.bf16.mxu0 %v973_v43 }
  0x2d   :  { %601 = vmatprep.mubr.bf16.mxu1 %v975_v44  ;;  %905 = vmatpush3.bf16.msra.mxu0 %v979_v45 }
  0x2e   :  { %922 = vmatpush3.bf16.msra.mxu1 %v979_v45  ;;  %906 = vmatprep.subr.bf16.mxu0 %v986_v46 }
  0x2f   :  { %919 = vmatprep.subr.bf16.mxu1 %v986_v46 }
  0x31   :  { %907 = vmatpush3.bf16.msra.mxu0 %v986_v46 }
  0x32   :  { %923 = vmatpush3.bf16.msra.mxu1 %v986_v46 }
  0x33   :  { %537 = vmatmul.mubr.bf16.gmra.mrb[8].mxu0 %v977_v47 }
  0x34   :  { %602 = vmatmul.mubr.bf16.gmra.mrb[8].mxu1 %v978_v48  ;;  %544 = vmatprep.mubr.bf16.mxu0 %v980_v49 }
  0x35   :  { %609 = vmatprep.mubr.bf16.mxu1 %v982_v50 }
  0x3b   :  { %545 = vmatmul.mubr.bf16.gmra.mrb[12].mxu0 %v984_v55 }
  0x3c   :  { %610 = vmatmul.mubr.bf16.gmra.mrb[12].mxu1 %v985_v56  ;;  %908 = vmatprep.mubr.msk.bf16.mxu0 %vm475_vm0, %v987_v57 }
  0x3d   :  { %912 = vmatprep.mubr.msk.bf16.mxu1 %vm475_vm0, %v988_v59 }
  0x43   :  { %909 = vmatmul.mubr.msk.bf16.vlgmr.msra.gmra.mrb[16].mxu0 %vm475_vm0, %v989_v63 }
  0x44   :  { %913 = vmatmul.mubr.msk.bf16.vlgmr.msra.gmra.mrb[16].mxu1 %vm475_vm0, %v990_v0 }
  0x92   :  { %v122_v1 = vpop.permute.xlu0 %121 }
  0x93   :  { %v132_v18 = vpop.permute.xlu1 %131 }
  0x96   :  { %v127_v3 = vpop.permute.xlu0 %126 }
  0x97   :  { %v137_v33 = vpop.permute.xlu1 %136 }
  0x9a   :  { %v142_v36 = vpop.permute.xlu0 %141 }
  0x9b   :  { %v147_v50 = vpop.permute.xlu1 %146 }
  0x9e   :  { %v152_v54 = vpop.permute.xlu0 %151 }
  0xf6   :  { %v828_v2 = vpop.f32.mrb[0].mxu0 }
  0xf7   :  { %v868_v4 = vpop.f32.mrb[0].mxu1  ;;  %v829_v5 = vpop.f32.mrb[1].mxu0 }
  0xf8   :  { %v830_v6 = vadd.f32 %v829_v5, %v828_v2  ;;  %v869_v7 = vpop.f32.mrb[1].mxu1  ;;  %v831_v8 = vpop.f32.mrb[2].mxu0 }
  0xf9   :  { %v870_v9 = vadd.f32 %v869_v7, %v868_v4  ;;  %v871_v10 = vpop.f32.mrb[2].mxu1  ;;  %v832_v11 = vpop.f32.mrb[3].mxu0 }
  0xfa   :  { %v523_v12 = vadd.f32 %v830_v6, %v122_v1  ;;  %v833_v13 = vadd.f32 %v832_v11, %v831_v8  ;;  %v872_v14 = vpop.f32.mrb[3].mxu1  ;;  %v157_v4 = vpop.permute.xlu1 %156 }
  0xfb   :  { %v873_v15 = vadd.f32 %v872_v14, %v871_v10 }
  0xfc   :  { %v526_v16 = vadd.f32 %v833_v13, %v127_v3  ;;  %v588_v17 = vadd.f32 %v870_v9, %v523_v12 }
  0xfe   :  { %v834_v19 = vpop.f32.mrb[4].mxu0  ;;  %v1208_v20 = vadd.f32 %v873_v15, %v526_v16 }
  0xff   :  { %v874_v21 = vpop.f32.mrb[4].mxu1  ;;  %v835_v22 = vpop.f32.mrb[5].mxu0 }
 0x100   :  { %v836_v23 = vadd.f32 %v835_v22, %v834_v19  ;;  %v875_v24 = vpop.f32.mrb[5].mxu1  ;;  %v837_v25 = vpop.f32.mrb[6].mxu0 }
 0x101   :  { %v876_v26 = vadd.f32 %v875_v24, %v874_v21  ;;  %v877_v27 = vpop.f32.mrb[6].mxu1  ;;  %v838_v28 = vpop.f32.mrb[7].mxu0 }
 0x102   :  { %v531_v29 = vadd.f32 %v836_v23, %v132_v18  ;;  %v839_v30 = vadd.f32 %v838_v28, %v837_v25  ;;  %v878_v31 = vpop.f32.mrb[7].mxu1 }
 0x103   :  { %v879_v32 = vadd.f32 %v878_v31, %v877_v27 }
 0x104   :  { %v534_v34 = vadd.f32 %v839_v30, %v137_v33  ;;  %v596_v35 = vadd.f32 %v876_v26, %v531_v29 }
 0x106   :  { %v840_v37 = vpop.f32.mrb[8].mxu0  ;;  %v599_v38 = vadd.f32 %v879_v32, %v534_v34 }
 0x107   :  { %v880_v39 = vpop.f32.mrb[8].mxu1  ;;  %v841_v40 = vpop.f32.mrb[9].mxu0 }
 0x108   :  { %v842_v41 = vadd.f32 %v841_v40, %v840_v37  ;;  %v881_v42 = vpop.f32.mrb[9].mxu1  ;;  %v843_v43 = vpop.f32.mrb[10].mxu0 }
 0x109   :  { %v882_v44 = vadd.f32 %v881_v42, %v880_v39  ;;  %v883_v45 = vpop.f32.mrb[10].mxu1  ;;  %v844_v46 = vpop.f32.mrb[11].mxu0 }
 0x10a   :  { %v539_v47 = vadd.f32 %v842_v41, %v142_v36  ;;  %v845_v48 = vadd.f32 %v844_v46, %v843_v43  ;;  %v884_v49 = vpop.f32.mrb[11].mxu1 }
 0x10b   :  { %v885_v51 = vadd.f32 %v884_v49, %v883_v45 }
 0x10c   :  { %v542_v52 = vadd.f32 %v845_v48, %v147_v50  ;;  %v604_v53 = vadd.f32 %v882_v44, %v539_v47 }
 0x10e   :  { %v846_v55 = vpop.f32.mrb[12].mxu0  ;;  %v607_v56 = vadd.f32 %v885_v51, %v542_v52 }
 0x10f   :  { %v886_v57 = vpop.f32.mrb[12].mxu1  ;;  %v847_v58 = vpop.f32.mrb[13].mxu0 }
 0x110   :  { %v848_v59 = vadd.f32 %v847_v58, %v846_v55  ;;  %v887_v60 = vpop.f32.mrb[13].mxu1  ;;  %v849_v61 = vpop.f32.mrb[14].mxu0 }
 0x111   :  { %v888_v62 = vadd.f32 %v887_v60, %v886_v57  ;;  %v889_v63 = vpop.f32.mrb[14].mxu1  ;;  %v850_v0 = vpop.f32.mrb[15].mxu0 }
 0x112   :  { %v547_v1 = vadd.f32 %v848_v59, %v152_v54  ;;  %v851_v2 = vadd.f32 %v850_v0, %v849_v61  ;;  %v890_v3 = vpop.f32.mrb[15].mxu1 }
 0x113   :  { %v891_v5 = vadd.f32 %v890_v3, %v889_v63 }
 0x114   :  { %v550_v6 = vadd.f32 %v851_v2, %v157_v4  ;;  %v612_v7 = vadd.f32 %v888_v62, %v547_v1 }
 0x116   :  { %v910_v8 = vpop.f32.mrb[16].mxu0  ;;  %v615_v9 = vadd.f32 %v891_v5, %v550_v6 }
 0x117   :  { %v661_v10 = vadd.f32 %v910_v8, %v596_v35  ;;  %v914_v11 = vpop.f32.mrb[16].mxu1  ;;  %v652_v12 = vpop.f32.mrb[17].mxu0 }
 0x118   :  { %v677_v13 = vadd.f32 %v914_v11, %v612_v7  ;;  %v653_v14 = vadd.f32 %v652_v12, %v588_v17  ;;  %v668_v15 = vpop.f32.mrb[17].mxu1  ;;  %v911_v16 = vpop.f32.mrb[18].mxu0 }
 0x119   :  { %v685_v18 = vmax.f32 %v661_v10, 0.0  ;;  %v669_v19 = vadd.f32 %v668_v15, %v604_v53  ;;  %v664_v21 = vadd.f32 %v911_v16, %v599_v38  ;;  %v915_v22 = vpop.f32.mrb[18].mxu1  ;;  %v655_v23 = vpop.f32.mrb[19].mxu0 }
 0x11a   :  { %v689_v24 = vmax.f32 %v677_v13, 0.0  ;;  %v683_v25 = vmax.f32 %v653_v14, 0.0  ;;  %v680_v26 = vadd.f32 %v915_v22, %v615_v9  ;;  %v656_v27 = vadd.f32 %v655_v23, %v1208_v20  ;;  %v671_v28 = vpop.f32.mrb[19].mxu1 }
 0x11b   :  { %v806_v29 = vpack.c.bf16 %v685_v18, %v685_v18  ;;  %v687_v30 = vmax.f32 %v669_v19, 0.0  ;;  %v686_v31 = vmax.f32 %v664_v21, 0.0  ;;  %v672_v32 = vadd.f32 %v671_v28, %v607_v56 }
 0x11c   :  { %v810_v33 = vpack.c.bf16 %v689_v24, %v689_v24  ;;  %v804_v17 = vpack.c.bf16 %v683_v25, %v683_v25  ;;  %v690_v34 = vmax.f32 %v680_v26, 0.0  ;;  %v684_v35 = vmax.f32 %v656_v27, 0.0 }
 0x11d   :  { %726 = vst.msk [vmem:[%s1246_s3 + $0x8] sm:$0xf] %vm723_vm1, %v806_v29  ;;  %v808_v36 = vpack.c.bf16 %v687_v30, %v687_v30  ;;  %v807_v37 = vpack.c.bf16 %v686_v31, %v686_v31  ;;  %v688_v38 = vmax.f32 %v672_v32, 0.0 }
 0x11e   :  { %730 = vst.msk [vmem:[%s1246_s3 + $0x18] sm:$0xf] %vm723_vm1, %v810_v33  ;;  %724 = vst.msk [vmem:[%s1246_s3] sm:$0xf] %vm723_vm1, %v804_v17  ;;  %v811_v20 = vpack.c.bf16 %v690_v34, %v690_v34  ;;  %v805_v39 = vpack.c.bf16 %v684_v35, %v684_v35 }
 0x11f   :  { %728 = vst.msk [vmem:[%s1246_s3 + $0x10] sm:$0xf] %vm723_vm1, %v808_v36  ;;  %727 = vst.msk [vmem:[%s1246_s3 + $0xc] sm:$0xf] %vm723_vm1, %v807_v37  ;;  %v809_v40 = vpack.c.bf16 %v688_v38, %v688_v38 }
 0x120   :  { %731 = vst.msk [vmem:[%s1246_s3 + $0x1c] sm:$0xf] %vm723_vm1, %v811_v20  ;;  %725 = vst.msk [vmem:[%s1246_s3 + $0x4] sm:$0xf] %vm723_vm1, %v805_v39 }
 0x121   :  { %729 = vst.msk [vmem:[%s1246_s3 + $0x14] sm:$0xf] %vm723_vm1, %v809_v40 }

</bundles_post_ra>
